<compile_context>
chip_gen: v7x
topology: tpu7x:2x2x1
jax: 0.10.0
libtpu: 0.0.40
codegen_flags: <defaults>
</compile_context>

<pallas_src>
import functools
import math

import jax
import jax.numpy as jnp
from jax.experimental import pallas as pl
from jax.experimental.pallas import tpu as pltpu

_INV_SQRT2 = 1.0 / math.sqrt(2.0)
_MASK_BIAS = -1e30   # additive mask value; exp() underflows to exactly 0


# ------------------------------ kernel helpers ------------------------------

def _gelu_erf(x):
    # exact (erf) GELU, matching HF "gelu"; computed in f32
    return 0.5 * x * (1.0 + jax.lax.erf(x * _INV_SQRT2))


def _masked_layernorm(x, gamma, beta, *, eps, h_true):
    """LayerNorm over the true hidden width `h_true` of a lane-padded
    [rows, Hp] tile.  Padded lanes of x are exactly zero; gamma/beta are
    zero-padded so padded output lanes stay exactly zero."""
    hp = x.shape[-1]
    lane = jax.lax.broadcasted_iota(jnp.int32, (1, hp), 1)
    valid = (lane < h_true).astype(jnp.float32)
    inv_h = 1.0 / float(h_true)
    mu = jnp.sum(x * valid, axis=-1, keepdims=True) * inv_h
    d = (x - mu) * valid
    var = jnp.sum(d * d, axis=-1, keepdims=True) * inv_h
    return d * jax.lax.rsqrt(var + eps) * gamma + beta


# ------------------------------ fused kernel --------------------------------

def _roberta_stack_kernel(emb_ref, bias_ref, eg_ref, eb_ref,
                          wqkv_ref, bqkv_ref, wo_ref, bo_ref,
                          ln1g_ref, ln1b_ref,
                          w1_ref, b1_ref, w2_ref, b2_ref,
                          ln2g_ref, ln2b_ref,
                          out_ref, h_ref,
                          *, num_heads, head_dim_p, eps, h_true):
    """Grid step 0: embedding LayerNorm.  Grid step i>0: transformer layer
    i-1 (fused attention + FFN block).  Residual stream carried in h_ref."""
    step = pl.program_id(0)

    @pl.when(step == 0)
    def _embedding_layernorm():
        h0 = _masked_layernorm(emb_ref[...], eg_ref[...], eb_ref[...],
                               eps=eps, h_true=h_true)
        h_ref[...] = h0
        out_ref[0] = h0

    @pl.when(step > 0)
    def _transformer_layer():
        x = h_ref[...]                                   # (M, Hp) f32 carry
        hp = x.shape[-1]

        # ---- fused QKV projection (softmax scale pre-folded into Q weights)
        qkv = jnp.dot(x.astype(jnp.bfloat16), wqkv_ref[0],
                      preferred_element_type=jnp.float32) + bqkv_ref[0]

        def split_heads(which):                          # -> (nH, M, Dhp) bf16
            base = which * hp
            return jnp.stack(
                [qkv[:, base + h * head_dim_p: base + (h + 1) * head_dim_p]
                 for h in range(num_heads)]).astype(jnp.bfloat16)

        q3 = split_heads(0)
        k3 = split_heads(1)
        v3 = split_heads(2)

        # ---- all heads in one batched MXU stream; batch elements are kept
        #      inside the same rows and separated by the block-diagonal mask.
        s = jnp.einsum('hqd,hkd->hqk', q3, k3,
                       preferred_element_type=jnp.float32)      # (nH, M, M)
        s = s + bias_ref[...]                            # (M, M) broadcast
        s = s - jnp.max(s, axis=-1, keepdims=True)
        p = jnp.exp(s)
        p = p * pl.reciprocal(jnp.sum(p, axis=-1, keepdims=True), approx=True)
        ctx3 = jnp.einsum('hqk,hkd->hqd', p.astype(jnp.bfloat16), v3,
                          preferred_element_type=jnp.float32)   # (nH, M, Dhp)
        ctx = jnp.concatenate([ctx3[h] for h in range(num_heads)], axis=-1)

        attn = jnp.dot(ctx.astype(jnp.bfloat16), wo_ref[0],
                       preferred_element_type=jnp.float32) + bo_ref[0]
        h1 = _masked_layernorm(attn + x, ln1g_ref[0], ln1b_ref[0],
                               eps=eps, h_true=h_true)

        # ---- fused FFN: up-proj + GELU + down-proj + residual + LayerNorm
        u = jnp.dot(h1.astype(jnp.bfloat16), w1_ref[0],
                    preferred_element_type=jnp.float32) + b1_ref[0]
        u = _gelu_erf(u)
        y = jnp.dot(u.astype(jnp.bfloat16), w2_ref[0],
                    preferred_element_type=jnp.float32) + b2_ref[0]
        h2 = _masked_layernorm(y + h1, ln2g_ref[0], ln2b_ref[0],
                               eps=eps, h_true=h_true)

        h_ref[...] = h2
        out_ref[0] = h2


# -------------------------------- wrapper ------------------------------------

def roberta_stack(emb, bias2d, pp, cfg):
    """One pallas_call for the whole model.  Returns (L+1, M, Hp) hidden
    states (embedding LN output + every layer output)."""
    M, Hp = emb.shape
    L = cfg.num_layers
    Ip = cfg.intermediate_padded
    assert M % 8 == 0 and Hp % 128 == 0 and Ip % 128 == 0

    def res(shape):
        # resident block (constant index): fetched once, reused every step
        return pl.BlockSpec(shape, lambda i, _n=len(shape): (0,) * _n)

    def per_layer(shape):
        # layer-stacked weights; step i>0 uses layer i-1; step 0 prefetches
        # layer 0 (same block index as step 1 -> no redundant DMA).
        nd = len(shape)
        return pl.BlockSpec(
            (1,) + shape,
            lambda i, _n=nd: (jnp.maximum(i - 1, 0),) + (0,) * _n)

    kernel = functools.partial(
        _roberta_stack_kernel, num_heads=cfg.num_heads,
        head_dim_p=cfg.head_dim_padded, eps=cfg.layer_norm_eps,
        h_true=cfg.hidden_size)

    return pl.pallas_call(
        kernel,
        grid=(L + 1,),
        in_specs=[res((M, Hp)), res((M, M)), res((1, Hp)), res((1, Hp)),
                  per_layer((Hp, 3 * Hp)), per_layer((1, 3 * Hp)),
                  per_layer((Hp, Hp)), per_layer((1, Hp)),
                  per_layer((1, Hp)), per_layer((1, Hp)),
                  per_layer((Hp, Ip)), per_layer((1, Ip)),
                  per_layer((Ip, Hp)), per_layer((1, Hp)),
                  per_layer((1, Hp)), per_layer((1, Hp))],
        out_specs=pl.BlockSpec((1, M, Hp), lambda i: (i, 0, 0)),
        out_shape=jax.ShapeDtypeStruct((L + 1, M, Hp), jnp.float32),
        scratch_shapes=[pltpu.VMEM((M, Hp), jnp.float32)],  # residual carry
        compiler_params=pltpu.CompilerParams(
            dimension_semantics=("arbitrary",)),
    )(emb, bias2d, pp["emb_ln_g"], pp["emb_ln_b"],
      pp["wqkv"], pp["bqkv"], pp["wo"], pp["bo"],
      pp["ln1_g"], pp["ln1_b"],
      pp["w1"], pp["b1"], pp["w2"], pp["b2"],
      pp["ln2_g"], pp["ln2_b"])


# ------------------------------ Model config ---------------------------------

class Config:
    vocab_size = 100
    hidden_size = 32
    num_heads = 4
    num_layers = 2
    intermediate_size = 64
    max_position_embeddings = 40   # seq + padding_idx offset headroom
    type_vocab_size = 1            # RoBERTa uses a single token type
    pad_token_id = 1               # RoBERTa padding_idx
    layer_norm_eps = 1e-5
    # TPU lane-dense padded dims (lane width = 128)
    hidden_padded = 128
    intermediate_padded = 128

    @property
    def head_dim(self):
        return self.hidden_size // self.num_heads

    @property
    def head_dim_padded(self):
        return self.hidden_padded // self.num_heads


def init_params(key, cfg):
    """True-size synthetic weights (the reference module loads a pretrained
    checkpoint; here we use deterministic PRNG init)."""
    n_keys = 8 + 16 * cfg.num_layers
    keys = iter(jax.random.split(key, n_keys))

    def normal(shape):
        return 0.02 * jax.random.normal(next(keys), shape, jnp.float32)

    H, I = cfg.hidden_size, cfg.intermediate_size
    params = {
        "word_emb": normal((cfg.vocab_size, H)),
        "pos_emb": normal((cfg.max_position_embeddings, H)),
        "type_emb": normal((cfg.type_vocab_size, H)),
        "emb_ln_g": jnp.ones((H,), jnp.float32),
        "emb_ln_b": jnp.zeros((H,), jnp.float32),
        "layers": [],
    }
    for _ in range(cfg.num_layers):
        params["layers"].append({
            "wq": normal((H, H)), "bq": jnp.zeros((H,), jnp.float32),
            "wk": normal((H, H)), "bk": jnp.zeros((H,), jnp.float32),
            "wv": normal((H, H)), "bv": jnp.zeros((H,), jnp.float32),
            "wo": normal((H, H)), "bo": jnp.zeros((H,), jnp.float32),
            "ln1_g": jnp.ones((H,), jnp.float32),
            "ln1_b": jnp.zeros((H,), jnp.float32),
            "w1": normal((H, I)), "b1": jnp.zeros((I,), jnp.float32),
            "w2": normal((I, H)), "b2": jnp.zeros((H,), jnp.float32),
            "ln2_g": jnp.ones((H,), jnp.float32),
            "ln2_b": jnp.zeros((H,), jnp.float32),
        })
    return params


def pad_params(params, cfg):
    """Repack weights into the lane-dense padded layout, stacked along a
    leading [num_layers] axis.  Matmul weights in bf16 (f32 accumulation
    in-kernel), biases / LN params in f32.  The 1/sqrt(head_dim) softmax
    scale is folded into the Q weights/bias here (in f32, before bf16 cast)."""
    H, I = cfg.hidden_size, cfg.intermediate_size
    Hp, Ip = cfg.hidden_padded, cfg.intermediate_padded
    nH, Dh, Dhp = cfg.num_heads, cfg.head_dim, cfg.head_dim_padded
    assert Dhp >= Dh and nH * Dhp == Hp and Hp % 128 == 0 and Ip % 128 == 0
    q_scale = 1.0 / math.sqrt(Dh)

    def pad2(w, shape):
        return jnp.zeros(shape, jnp.float32).at[:w.shape[0], :w.shape[1]].set(w)

    def pad_row(v, n):
        return jnp.zeros((1, n), jnp.float32).at[0, :v.shape[0]].set(v)

    def pad_head_cols(w):   # (H, H) -> (Hp, Hp); output columns grouped per head
        w3 = w.reshape(H, nH, Dh)
        out = jnp.zeros((Hp, nH, Dhp), jnp.float32).at[:H, :, :Dh].set(w3)
        return out.reshape(Hp, Hp)

    def pad_head_bias(v):   # (H,) -> (1, Hp)
        v2 = v.reshape(nH, Dh)
        out = jnp.zeros((nH, Dhp), jnp.float32).at[:, :Dh].set(v2)
        return out.reshape(1, Hp)

    def pad_head_rows(w):   # (H, H) -> (Hp, Hp); input rows grouped per head
        w3 = w.reshape(nH, Dh, H)
        out = jnp.zeros((nH, Dhp, Hp), jnp.float32).at[:, :Dh, :H].set(w3)
        return out.reshape(Hp, Hp)

    padded = {
        "word_emb": pad2(params["word_emb"], (cfg.vocab_size, Hp)),
        "pos_emb": pad2(params["pos_emb"], (cfg.max_position_embeddings, Hp)),
        "type_emb": pad2(params["type_emb"], (cfg.type_vocab_size, Hp)),
        "emb_ln_g": pad_row(params["emb_ln_g"], Hp),
        "emb_ln_b": pad_row(params["emb_ln_b"], Hp),
    }

    names = ("wqkv", "bqkv", "wo", "bo", "ln1_g", "ln1_b",
             "w1", "b1", "w2", "b2", "ln2_g", "ln2_b")
    stacked = {k: [] for k in names}
    for l in params["layers"]:
        wqkv = jnp.concatenate(
            [pad_head_cols(l["wq"] * q_scale), pad_head_cols(l["wk"]),
             pad_head_cols(l["wv"])], axis=1)
        bqkv = jnp.concatenate(
            [pad_head_bias(l["bq"] * q_scale), pad_head_bias(l["bk"]),
             pad_head_bias(l["bv"])], axis=1)
        stacked["wqkv"].append(wqkv.astype(jnp.bfloat16))
        stacked["bqkv"].append(bqkv)
        stacked["wo"].append(pad_head_rows(l["wo"]).astype(jnp.bfloat16))
        stacked["bo"].append(pad_row(l["bo"], Hp))
        stacked["ln1_g"].append(pad_row(l["ln1_g"], Hp))
        stacked["ln1_b"].append(pad_row(l["ln1_b"], Hp))
        stacked["w1"].append(pad2(l["w1"], (Hp, Ip)).astype(jnp.bfloat16))
        stacked["b1"].append(pad_row(l["b1"], Ip))
        stacked["w2"].append(pad2(l["w2"], (Ip, Hp)).astype(jnp.bfloat16))
        stacked["b2"].append(pad_row(l["b2"], Hp))
        stacked["ln2_g"].append(pad_row(l["ln2_g"], Hp))
        stacked["ln2_b"].append(pad_row(l["ln2_b"], Hp))
    for k in names:
        padded[k] = jnp.stack(stacked[k])
    return padded


# ------------------------------ Forward pass ---------------------------------

def roberta_forward(pp, ids, mask, token_type_ids, cfg):
    """Returns the tuple of hidden states (embedding output + every layer),
    matching `out` of RobertaModel(..., output_hidden_states=True)."""
    B, S = ids.shape
    H, Hp = cfg.hidden_size, cfg.hidden_padded
    M = B * S

    # RoBERTa padding-aware position ids
    not_pad = (ids != cfg.pad_token_id).astype(jnp.int32)
    position_ids = jnp.cumsum(not_pad, axis=1) * not_pad + cfg.pad_token_id

    # embedding gathers are plain-JAX glue (lane-padded tables)
    emb = (pp["word_emb"][ids]
           + pp["pos_emb"][position_ids]
           + pp["type_emb"][token_type_ids])
    emb = emb.reshape(M, Hp).astype(jnp.float32)

    # Block-diagonal (per-sequence) + key-padding additive mask shared by all
    # heads: lets the kernel run attention over all B*S rows in one batched
    # MXU stream while keeping per-sequence softmax semantics exact.
    batch_id = jnp.repeat(jnp.arange(B, dtype=jnp.int32), S)
    key_valid = mask.reshape(M).astype(jnp.int32)
    allowed = (batch_id[:, None] == batch_id[None, :]) & (key_valid[None, :] > 0)
    bias2d = jnp.where(allowed, 0.0, _MASK_BIAS).astype(jnp.float32)

    # TODO(synk): dropout is identity in eval mode, so it is omitted.
    out = roberta_stack(emb, bias2d, pp, cfg)            # (L+1, M, Hp)

    # strip lane padding once on the stacked slab -> tuple of (B, S, H)
    out = out.reshape(cfg.num_layers + 1, B, S, Hp)[:, :, :, :H]
    return tuple(out[i] for i in range(cfg.num_layers + 1))


# ---------------------------------- Main --------------------------------------

if __name__ == "__main__":
    cfg = Config()
    key = jax.random.PRNGKey(0)
    pkey, ikey = jax.random.split(key)
    params = pad_params(init_params(pkey, cfg), cfg)

    B, S = 2, 8
    ids = jax.random.randint(ikey, (B, S), 2, cfg.vocab_size, dtype=jnp.int32)
    # pad the tail of the second sequence
    ids = ids.at[1, 6:].set(cfg.pad_token_id)
    mask = (ids != cfg.pad_token_id).astype(jnp.int32)
    token_type_ids = jnp.zeros((B, S), dtype=jnp.int32)

    out = roberta_forward(params, ids, mask, token_type_ids, cfg)
    out = jax.block_until_ready(out)

    assert len(out) == cfg.num_layers + 1
    for hs in out:
        assert hs.shape == (B, S, cfg.hidden_size)
        assert bool(jnp.all(jnp.isfinite(hs)))
    print("KERNEL_OK")
</pallas_src>

<mosaic_0001>
module attributes {stable_mosaic.version = 11 : i64} {
  func.func @_roberta_stack_kernel(%arg0: i32, %arg1: memref<16x128xf32, #tpu.memory_space<vmem>>, %arg2: memref<16x16xf32, #tpu.memory_space<vmem>>, %arg3: memref<1x128xf32, #tpu.memory_space<vmem>>, %arg4: memref<1x128xf32, #tpu.memory_space<vmem>>, %arg5: memref<1x128x384xbf16, #tpu.memory_space<vmem>>, %arg6: memref<1x1x384xf32, #tpu.memory_space<vmem>>, %arg7: memref<1x128x128xbf16, #tpu.memory_space<vmem>>, %arg8: memref<1x1x128xf32, #tpu.memory_space<vmem>>, %arg9: memref<1x1x128xf32, #tpu.memory_space<vmem>>, %arg10: memref<1x1x128xf32, #tpu.memory_space<vmem>>, %arg11: memref<1x128x128xbf16, #tpu.memory_space<vmem>>, %arg12: memref<1x1x128xf32, #tpu.memory_space<vmem>>, %arg13: memref<1x128x128xbf16, #tpu.memory_space<vmem>>, %arg14: memref<1x1x128xf32, #tpu.memory_space<vmem>>, %arg15: memref<1x1x128xf32, #tpu.memory_space<vmem>>, %arg16: memref<1x1x128xf32, #tpu.memory_space<vmem>>, %arg17: memref<1x16x128xf32, #tpu.memory_space<vmem>>, %arg18: memref<16x128xf32, #tpu.memory_space<vmem>>) attributes {dimension_semantics = [#tpu.dimension_semantics<arbitrary>], iteration_bounds = array<i64: 3>, scalar_prefetch = 0 : i64, scratch_operands = 1 : i64, tpu.core_type = #tpu.core_type<tc>, window_params = [{pipeline_mode = #tpu.pipeline_mode<synchronous>, transform_indices = @transform_0, window_bounds = array<i64: 16, 128>}, {pipeline_mode = #tpu.pipeline_mode<synchronous>, transform_indices = @transform_1, window_bounds = array<i64: 16, 16>}, {pipeline_mode = #tpu.pipeline_mode<synchronous>, transform_indices = @transform_2, window_bounds = array<i64: 1, 128>}, {pipeline_mode = #tpu.pipeline_mode<synchronous>, transform_indices = @transform_3, window_bounds = array<i64: 1, 128>}, {transform_indices = @transform_4, window_bounds = array<i64: 1, 128, 384>}, {transform_indices = @transform_5, window_bounds = array<i64: 1, 1, 384>}, {transform_indices = @transform_6, window_bounds = array<i64: 1, 128, 128>}, {transform_indices = @transform_7, window_bounds = array<i64: 1, 1, 128>}, {transform_indices = @transform_8, window_bounds = array<i64: 1, 1, 128>}, {transform_indices = @transform_9, window_bounds = array<i64: 1, 1, 128>}, {transform_indices = @transform_10, window_bounds = array<i64: 1, 128, 128>}, {transform_indices = @transform_11, window_bounds = array<i64: 1, 1, 128>}, {transform_indices = @transform_12, window_bounds = array<i64: 1, 128, 128>}, {transform_indices = @transform_13, window_bounds = array<i64: 1, 1, 128>}, {transform_indices = @transform_14, window_bounds = array<i64: 1, 1, 128>}, {transform_indices = @transform_15, window_bounds = array<i64: 1, 1, 128>}, {transform_indices = @transform_16, window_bounds = array<i64: 1, 16, 128>}]} {
    %c0_i32 = arith.constant 0 : i32
    %0 = arith.cmpi eq, %arg0, %c0_i32 : i32
    %1 = arith.extui %0 : i1 to i32
    %c0_i32_0 = arith.constant 0 : i32
    %2 = arith.cmpi ne, %1, %c0_i32_0 : i32
    scf.if %2 {
      %c0 = arith.constant 0 : index
      %c0_3 = arith.constant 0 : index
      %6 = vector.load %arg1[%c0, %c0_3] : memref<16x128xf32, #tpu.memory_space<vmem>>, vector<16x128xf32>
      %c0_4 = arith.constant 0 : index
      %c0_5 = arith.constant 0 : index
      %7 = vector.load %arg3[%c0_4, %c0_5] : memref<1x128xf32, #tpu.memory_space<vmem>>, vector<1x128xf32>
      %c0_6 = arith.constant 0 : index
      %c0_7 = arith.constant 0 : index
      %8 = vector.load %arg4[%c0_6, %c0_7] : memref<1x128xf32, #tpu.memory_space<vmem>>, vector<1x128xf32>
      %9 = tpu.iota {dimensions = array<i32: 1>} : vector<1x128xi32>
      %c32_i32 = arith.constant 32 : i32
      %10 = vector.broadcast %c32_i32 : i32 to vector<1x128xi32>
      %11 = arith.cmpi slt, %9, %10 : vector<1x128xi32>
      %12 = arith.extui %11 : vector<1x128xi1> to vector<1x128xi32>
      %13 = arith.sitofp %12 : vector<1x128xi32> to vector<1x128xf32>
      %14 = vector.broadcast %13 : vector<1x128xf32> to vector<16x128xf32>
      %15 = arith.mulf %6, %14 : vector<16x128xf32>
      %cst = arith.constant dense<0.000000e+00> : vector<16xf32>
      %16 = vector.multi_reduction <add>, %15, %cst [1] : vector<16x128xf32> to vector<16xf32>
      %17 = vector.shape_cast %16 : vector<16xf32> to vector<16x1xf32>
      %cst_8 = arith.constant 3.125000e-02 : f32
      %18 = vector.broadcast %cst_8 : f32 to vector<16x1xf32>
      %19 = arith.mulf %17, %18 : vector<16x1xf32>
      %20 = vector.broadcast %19 : vector<16x1xf32> to vector<16x128xf32>
      %21 = arith.subf %6, %20 : vector<16x128xf32>
      %22 = vector.broadcast %13 : vector<1x128xf32> to vector<16x128xf32>
      %23 = arith.mulf %21, %22 : vector<16x128xf32>
      %24 = arith.mulf %23, %23 : vector<16x128xf32>
      %cst_9 = arith.constant dense<0.000000e+00> : vector<16xf32>
      %25 = vector.multi_reduction <add>, %24, %cst_9 [1] : vector<16x128xf32> to vector<16xf32>
      %26 = vector.shape_cast %25 : vector<16xf32> to vector<16x1xf32>
      %cst_10 = arith.constant 3.125000e-02 : f32
      %27 = vector.broadcast %cst_10 : f32 to vector<16x1xf32>
      %28 = arith.mulf %26, %27 : vector<16x1xf32>
      %cst_11 = arith.constant 9.99999974E-6 : f32
      %29 = vector.broadcast %cst_11 : f32 to vector<16x1xf32>
      %30 = arith.addf %28, %29 : vector<16x1xf32>
      %31 = math.rsqrt %30 : vector<16x1xf32>
      %32 = vector.broadcast %31 : vector<16x1xf32> to vector<16x128xf32>
      %33 = arith.mulf %23, %32 : vector<16x128xf32>
      %34 = vector.broadcast %7 : vector<1x128xf32> to vector<16x128xf32>
      %35 = arith.mulf %33, %34 : vector<16x128xf32>
      %36 = vector.broadcast %8 : vector<1x128xf32> to vector<16x128xf32>
      %37 = arith.addf %35, %36 : vector<16x128xf32>
      %c0_12 = arith.constant 0 : index
      %c0_13 = arith.constant 0 : index
      %38 = vector.load %arg18[%c0_12, %c0_13] : memref<16x128xf32, #tpu.memory_space<vmem>>, vector<16x128xf32>
      tpu.vector_store %arg18[%c0_12, %c0_13], %37 {strides = array<i32>} : memref<16x128xf32, #tpu.memory_space<vmem>>, vector<16x128xf32>,
      %c0_14 = arith.constant 0 : index
      %c0_15 = arith.constant 0 : index
      %c0_16 = arith.constant 0 : index
      %39 = vector.load %arg17[%c0_14, %c0_15, %c0_16] : memref<1x16x128xf32, #tpu.memory_space<vmem>>, vector<1x16x128xf32>
      %40 = vector.shape_cast %39 : vector<1x16x128xf32> to vector<16x128xf32>
      %41 = vector.shape_cast %37 : vector<16x128xf32> to vector<1x16x128xf32>
      tpu.vector_store %arg17[%c0_14, %c0_15, %c0_16], %41 {strides = array<i32>} : memref<1x16x128xf32, #tpu.memory_space<vmem>>, vector<1x16x128xf32>,
    } else {
    }
    %c0_i32_1 = arith.constant 0 : i32
    %3 = arith.cmpi sgt, %arg0, %c0_i32_1 : i32
    %4 = arith.extui %3 : i1 to i32
    %c0_i32_2 = arith.constant 0 : i32
    %5 = arith.cmpi ne, %4, %c0_i32_2 : i32
    scf.if %5 {
      %c0 = arith.constant 0 : index
      %c0_3 = arith.constant 0 : index
      %6 = vector.load %arg18[%c0, %c0_3] : memref<16x128xf32, #tpu.memory_space<vmem>>, vector<16x128xf32>
      %7 = arith.truncf %6 : vector<16x128xf32> to vector<16x128xbf16>
      %c0_4 = arith.constant 0 : index
      %c0_5 = arith.constant 0 : index
      %c0_6 = arith.constant 0 : index
      %8 = vector.load %arg5[%c0_4, %c0_5, %c0_6] : memref<1x128x384xbf16, #tpu.memory_space<vmem>>, vector<1x128x384xbf16>
      %9 = vector.shape_cast %8 : vector<1x128x384xbf16> to vector<128x384xbf16>
      %cst = arith.constant dense<0.000000e+00> : vector<16x384xf32>
      %10 = tpu.matmul %7, %9, %cst {dimension_numbers = #tpu.dot_dimension_numbers<[1], [0], [0], [1], [0, 0, 1, 1], [], []>} : vector<16x128xbf16>, vector<128x384xbf16>, vector<16x384xf32> -> vector<16x384xf32>
      %c0_7 = arith.constant 0 : index
      %c0_8 = arith.constant 0 : index
      %c0_9 = arith.constant 0 : index
      %11 = vector.load %arg6[%c0_7, %c0_8, %c0_9] : memref<1x1x384xf32, #tpu.memory_space<vmem>>, vector<1x1x384xf32>
      %12 = vector.shape_cast %11 : vector<1x1x384xf32> to vector<1x384xf32>
      %13 = vector.broadcast %12 : vector<1x384xf32> to vector<16x384xf32>
      %14 = arith.addf %10, %13 : vector<16x384xf32>
      %15 = vector.extract_strided_slice %14 {offsets = [0, 0], sizes = [16, 32], strides = [1, 1]} : vector<16x384xf32> to vector<16x32xf32>
      %16 = vector.extract_strided_slice %14 {offsets = [0, 32], sizes = [16, 32], strides = [1, 1]} : vector<16x384xf32> to vector<16x32xf32>
      %17 = vector.extract_strided_slice %14 {offsets = [0, 64], sizes = [16, 32], strides = [1, 1]} : vector<16x384xf32> to vector<16x32xf32>
      %18 = vector.extract_strided_slice %14 {offsets = [0, 96], sizes = [16, 32], strides = [1, 1]} : vector<16x384xf32> to vector<16x32xf32>
      %19 = vector.shape_cast %15 : vector<16x32xf32> to vector<1x16x32xf32>
      %20 = vector.shape_cast %16 : vector<16x32xf32> to vector<1x16x32xf32>
      %21 = vector.shape_cast %17 : vector<16x32xf32> to vector<1x16x32xf32>
      %22 = vector.shape_cast %18 : vector<16x32xf32> to vector<1x16x32xf32>
      %23 = tpu.concatenate %19, %20, %21, %22 in 0 : vector<1x16x32xf32>, vector<1x16x32xf32>, vector<1x16x32xf32>, vector<1x16x32xf32> -> vector<4x16x32xf32>
      %24 = arith.truncf %23 : vector<4x16x32xf32> to vector<4x16x32xbf16>
      %25 = vector.extract_strided_slice %14 {offsets = [0, 128], sizes = [16, 32], strides = [1, 1]} : vector<16x384xf32> to vector<16x32xf32>
      %26 = vector.extract_strided_slice %14 {offsets = [0, 160], sizes = [16, 32], strides = [1, 1]} : vector<16x384xf32> to vector<16x32xf32>
      %27 = vector.extract_strided_slice %14 {offsets = [0, 192], sizes = [16, 32], strides = [1, 1]} : vector<16x384xf32> to vector<16x32xf32>
      %28 = vector.extract_strided_slice %14 {offsets = [0, 224], sizes = [16, 32], strides = [1, 1]} : vector<16x384xf32> to vector<16x32xf32>
      %29 = vector.shape_cast %25 : vector<16x32xf32> to vector<1x16x32xf32>
      %30 = vector.shape_cast %26 : vector<16x32xf32> to vector<1x16x32xf32>
      %31 = vector.shape_cast %27 : vector<16x32xf32> to vector<1x16x32xf32>
      %32 = vector.shape_cast %28 : vector<16x32xf32> to vector<1x16x32xf32>
      %33 = tpu.concatenate %29, %30, %31, %32 in 0 : vector<1x16x32xf32>, vector<1x16x32xf32>, vector<1x16x32xf32>, vector<1x16x32xf32> -> vector<4x16x32xf32>
      %34 = arith.truncf %33 : vector<4x16x32xf32> to vector<4x16x32xbf16>
      %35 = vector.extract_strided_slice %14 {offsets = [0, 256], sizes = [16, 32], strides = [1, 1]} : vector<16x384xf32> to vector<16x32xf32>
      %36 = vector.extract_strided_slice %14 {offsets = [0, 288], sizes = [16, 32], strides = [1, 1]} : vector<16x384xf32> to vector<16x32xf32>
      %37 = vector.extract_strided_slice %14 {offsets = [0, 320], sizes = [16, 32], strides = [1, 1]} : vector<16x384xf32> to vector<16x32xf32>
      %38 = vector.extract_strided_slice %14 {offsets = [0, 352], sizes = [16, 32], strides = [1, 1]} : vector<16x384xf32> to vector<16x32xf32>
      %39 = vector.shape_cast %35 : vector<16x32xf32> to vector<1x16x32xf32>
      %40 = vector.shape_cast %36 : vector<16x32xf32> to vector<1x16x32xf32>
      %41 = vector.shape_cast %37 : vector<16x32xf32> to vector<1x16x32xf32>
      %42 = vector.shape_cast %38 : vector<16x32xf32> to vector<1x16x32xf32>
      %43 = tpu.concatenate %39, %40, %41, %42 in 0 : vector<1x16x32xf32>, vector<1x16x32xf32>, vector<1x16x32xf32>, vector<1x16x32xf32> -> vector<4x16x32xf32>
      %44 = arith.truncf %43 : vector<4x16x32xf32> to vector<4x16x32xbf16>
      "tpu.trace_start"() <{level = 10 : i32, message = "hqd,hkd->hqk"}> : () -> ()
      %cst_10 = arith.constant dense<0.000000e+00> : vector<4x16x16xf32>
      %45 = tpu.matmul %24, %34, %cst_10 {dimension_numbers = #tpu.dot_dimension_numbers<[2], [2], [1], [1], [0, 0, 0, 1, 1, 1], [0], [0]>} : vector<4x16x32xbf16>, vector<4x16x32xbf16>, vector<4x16x16xf32> -> vector<4x16x16xf32>
      "tpu.trace_stop"() : () -> ()
      %c0_11 = arith.constant 0 : index
      %c0_12 = arith.constant 0 : index
      %46 = vector.load %arg2[%c0_11, %c0_12] : memref<16x16xf32, #tpu.memory_space<vmem>>, vector<16x16xf32>
      %47 = vector.shape_cast %46 : vector<16x16xf32> to vector<1x16x16xf32>
      %48 = vector.broadcast %47 : vector<1x16x16xf32> to vector<4x16x16xf32>
      %49 = arith.addf %45, %48 : vector<4x16x16xf32>
      %cst_13 = arith.constant dense<0xFF800000> : vector<4x16xf32>
      %50 = vector.multi_reduction <maximumf>, %49, %cst_13 [2] : vector<4x16x16xf32> to vector<4x16xf32>
      %51 = vector.shape_cast %50 : vector<4x16xf32> to vector<4x16x1xf32>
      %52 = vector.broadcast %51 : vector<4x16x1xf32> to vector<4x16x16xf32>
      %53 = arith.subf %49, %52 : vector<4x16x16xf32>
      %54 = math.exp %53 : vector<4x16x16xf32>
      %cst_14 = arith.constant dense<0.000000e+00> : vector<4x16xf32>
      %55 = vector.multi_reduction <add>, %54, %cst_14 [2] : vector<4x16x16xf32> to vector<4x16xf32>
      %56 = vector.shape_cast %55 : vector<4x16xf32> to vector<4x16x1xf32>
      %57 = tpu.reciprocal %56 {approx = true} : vector<4x16x1xf32> -> vector<4x16x1xf32>
      %58 = vector.broadcast %57 : vector<4x16x1xf32> to vector<4x16x16xf32>
      %59 = arith.mulf %54, %58 : vector<4x16x16xf32>
      %60 = arith.truncf %59 : vector<4x16x16xf32> to vector<4x16x16xbf16>
      "tpu.trace_start"() <{level = 10 : i32, message = "hqk,hkd->hqd"}> : () -> ()
      %cst_15 = arith.constant dense<0.000000e+00> : vector<4x16x32xf32>
      %61 = tpu.matmul %60, %44, %cst_15 {dimension_numbers = #tpu.dot_dimension_numbers<[2], [1], [1], [2], [0, 0, 0, 1, 1, 2], [0], [0]>} : vector<4x16x16xbf16>, vector<4x16x32xbf16>, vector<4x16x32xf32> -> vector<4x16x32xf32>
      "tpu.trace_stop"() : () -> ()
      %62 = vector.extract_strided_slice %61 {offsets = [0, 0, 0], sizes = [1, 16, 32], strides = [1, 1, 1]} : vector<4x16x32xf32> to vector<1x16x32xf32>
      %63 = vector.shape_cast %62 : vector<1x16x32xf32> to vector<16x32xf32>
      %64 = vector.extract_strided_slice %61 {offsets = [1, 0, 0], sizes = [1, 16, 32], strides = [1, 1, 1]} : vector<4x16x32xf32> to vector<1x16x32xf32>
      %65 = vector.shape_cast %64 : vector<1x16x32xf32> to vector<16x32xf32>
      %66 = vector.extract_strided_slice %61 {offsets = [2, 0, 0], sizes = [1, 16, 32], strides = [1, 1, 1]} : vector<4x16x32xf32> to vector<1x16x32xf32>
      %67 = vector.shape_cast %66 : vector<1x16x32xf32> to vector<16x32xf32>
      %68 = vector.extract_strided_slice %61 {offsets = [3, 0, 0], sizes = [1, 16, 32], strides = [1, 1, 1]} : vector<4x16x32xf32> to vector<1x16x32xf32>
      %69 = vector.shape_cast %68 : vector<1x16x32xf32> to vector<16x32xf32>
      %70 = tpu.concatenate %63, %65, %67, %69 in 1 : vector<16x32xf32>, vector<16x32xf32>, vector<16x32xf32>, vector<16x32xf32> -> vector<16x128xf32>
      %71 = arith.truncf %70 : vector<16x128xf32> to vector<16x128xbf16>
      %c0_16 = arith.constant 0 : index
      %c0_17 = arith.constant 0 : index
      %c0_18 = arith.constant 0 : index
      %72 = vector.load %arg7[%c0_16, %c0_17, %c0_18] : memref<1x128x128xbf16, #tpu.memory_space<vmem>>, vector<1x128x128xbf16>
      %73 = vector.shape_cast %72 : vector<1x128x128xbf16> to vector<128x128xbf16>
      %cst_19 = arith.constant dense<0.000000e+00> : vector<16x128xf32>
      %74 = tpu.matmul %71, %73, %cst_19 {dimension_numbers = #tpu.dot_dimension_numbers<[1], [0], [0], [1], [0, 0, 1, 1], [], []>} : vector<16x128xbf16>, vector<128x128xbf16>, vector<16x128xf32> -> vector<16x128xf32>
      %c0_20 = arith.constant 0 : index
      %c0_21 = arith.constant 0 : index
      %c0_22 = arith.constant 0 : index
      %75 = vector.load %arg8[%c0_20, %c0_21, %c0_22] : memref<1x1x128xf32, #tpu.memory_space<vmem>>, vector<1x1x128xf32>
      %76 = vector.shape_cast %75 : vector<1x1x128xf32> to vector<1x128xf32>
      %77 = vector.broadcast %76 : vector<1x128xf32> to vector<16x128xf32>
      %78 = arith.addf %74, %77 : vector<16x128xf32>
      %79 = arith.addf %78, %6 : vector<16x128xf32>
      %c0_23 = arith.constant 0 : index
      %c0_24 = arith.constant 0 : index
      %c0_25 = arith.constant 0 : index
      %80 = vector.load %arg9[%c0_23, %c0_24, %c0_25] : memref<1x1x128xf32, #tpu.memory_space<vmem>>, vector<1x1x128xf32>
      %81 = vector.shape_cast %80 : vector<1x1x128xf32> to vector<1x128xf32>
      %c0_26 = arith.constant 0 : index
      %c0_27 = arith.constant 0 : index
      %c0_28 = arith.constant 0 : index
      %82 = vector.load %arg10[%c0_26, %c0_27, %c0_28] : memref<1x1x128xf32, #tpu.memory_space<vmem>>, vector<1x1x128xf32>
      %83 = vector.shape_cast %82 : vector<1x1x128xf32> to vector<1x128xf32>
      %84 = tpu.iota {dimensions = array<i32: 1>} : vector<1x128xi32>
      %c32_i32 = arith.constant 32 : i32
      %85 = vector.broadcast %c32_i32 : i32 to vector<1x128xi32>
      %86 = arith.cmpi slt, %84, %85 : vector<1x128xi32>
      %87 = arith.extui %86 : vector<1x128xi1> to vector<1x128xi32>
      %88 = arith.sitofp %87 : vector<1x128xi32> to vector<1x128xf32>
      %89 = vector.broadcast %88 : vector<1x128xf32> to vector<16x128xf32>
      %90 = arith.mulf %79, %89 : vector<16x128xf32>
      %cst_29 = arith.constant dense<0.000000e+00> : vector<16xf32>
      %91 = vector.multi_reduction <add>, %90, %cst_29 [1] : vector<16x128xf32> to vector<16xf32>
      %92 = vector.shape_cast %91 : vector<16xf32> to vector<16x1xf32>
      %cst_30 = arith.constant 3.125000e-02 : f32
      %93 = vector.broadcast %cst_30 : f32 to vector<16x1xf32>
      %94 = arith.mulf %92, %93 : vector<16x1xf32>
      %95 = vector.broadcast %94 : vector<16x1xf32> to vector<16x128xf32>
      %96 = arith.subf %79, %95 : vector<16x128xf32>
      %97 = vector.broadcast %88 : vector<1x128xf32> to vector<16x128xf32>
      %98 = arith.mulf %96, %97 : vector<16x128xf32>
      %99 = arith.mulf %98, %98 : vector<16x128xf32>
      %cst_31 = arith.constant dense<0.000000e+00> : vector<16xf32>
      %100 = vector.multi_reduction <add>, %99, %cst_31 [1] : vector<16x128xf32> to vector<16xf32>
      %101 = vector.shape_cast %100 : vector<16xf32> to vector<16x1xf32>
      %cst_32 = arith.constant 3.125000e-02 : f32
      %102 = vector.broadcast %cst_32 : f32 to vector<16x1xf32>
      %103 = arith.mulf %101, %102 : vector<16x1xf32>
      %cst_33 = arith.constant 9.99999974E-6 : f32
      %104 = vector.broadcast %cst_33 : f32 to vector<16x1xf32>
      %105 = arith.addf %103, %104 : vector<16x1xf32>
      %106 = math.rsqrt %105 : vector<16x1xf32>
      %107 = vector.broadcast %106 : vector<16x1xf32> to vector<16x128xf32>
      %108 = arith.mulf %98, %107 : vector<16x128xf32>
      %109 = vector.broadcast %81 : vector<1x128xf32> to vector<16x128xf32>
      %110 = arith.mulf %108, %109 : vector<16x128xf32>
      %111 = vector.broadcast %83 : vector<1x128xf32> to vector<16x128xf32>
      %112 = arith.addf %110, %111 : vector<16x128xf32>
      %113 = arith.truncf %112 : vector<16x128xf32> to vector<16x128xbf16>
      %c0_34 = arith.constant 0 : index
      %c0_35 = arith.constant 0 : index
      %c0_36 = arith.constant 0 : index
      %114 = vector.load %arg11[%c0_34, %c0_35, %c0_36] : memref<1x128x128xbf16, #tpu.memory_space<vmem>>, vector<1x128x128xbf16>
      %115 = vector.shape_cast %114 : vector<1x128x128xbf16> to vector<128x128xbf16>
      %cst_37 = arith.constant dense<0.000000e+00> : vector<16x128xf32>
      %116 = tpu.matmul %113, %115, %cst_37 {dimension_numbers = #tpu.dot_dimension_numbers<[1], [0], [0], [1], [0, 0, 1, 1], [], []>} : vector<16x128xbf16>, vector<128x128xbf16>, vector<16x128xf32> -> vector<16x128xf32>
      %c0_38 = arith.constant 0 : index
      %c0_39 = arith.constant 0 : index
      %c0_40 = arith.constant 0 : index
      %117 = vector.load %arg12[%c0_38, %c0_39, %c0_40] : memref<1x1x128xf32, #tpu.memory_space<vmem>>, vector<1x1x128xf32>
      %118 = vector.shape_cast %117 : vector<1x1x128xf32> to vector<1x128xf32>
      %119 = vector.broadcast %118 : vector<1x128xf32> to vector<16x128xf32>
      %120 = arith.addf %116, %119 : vector<16x128xf32>
      %cst_41 = arith.constant 5.000000e-01 : f32
      %121 = vector.broadcast %cst_41 : f32 to vector<16x128xf32>
      %122 = arith.mulf %121, %120 : vector<16x128xf32>
      %cst_42 = arith.constant 0.707106769 : f32
      %123 = vector.broadcast %cst_42 : f32 to vector<16x128xf32>
      %124 = arith.mulf %120, %123 : vector<16x128xf32>
      %125 = math.erf %124 : vector<16x128xf32>
      %cst_43 = arith.constant 1.000000e+00 : f32
      %126 = vector.broadcast %cst_43 : f32 to vector<16x128xf32>
      %127 = arith.addf %126, %125 : vector<16x128xf32>
      %128 = arith.mulf %122, %127 : vector<16x128xf32>
      %129 = arith.truncf %128 : vector<16x128xf32> to vector<16x128xbf16>
      %c0_44 = arith.constant 0 : index
      %c0_45 = arith.constant 0 : index
      %c0_46 = arith.constant 0 : index
      %130 = vector.load %arg13[%c0_44, %c0_45, %c0_46] : memref<1x128x128xbf16, #tpu.memory_space<vmem>>, vector<1x128x128xbf16>
      %131 = vector.shape_cast %130 : vector<1x128x128xbf16> to vector<128x128xbf16>
      %cst_47 = arith.constant dense<0.000000e+00> : vector<16x128xf32>
      %132 = tpu.matmul %129, %131, %cst_47 {dimension_numbers = #tpu.dot_dimension_numbers<[1], [0], [0], [1], [0, 0, 1, 1], [], []>} : vector<16x128xbf16>, vector<128x128xbf16>, vector<16x128xf32> -> vector<16x128xf32>
      %c0_48 = arith.constant 0 : index
      %c0_49 = arith.constant 0 : index
      %c0_50 = arith.constant 0 : index
      %133 = vector.load %arg14[%c0_48, %c0_49, %c0_50] : memref<1x1x128xf32, #tpu.memory_space<vmem>>, vector<1x1x128xf32>
      %134 = vector.shape_cast %133 : vector<1x1x128xf32> to vector<1x128xf32>
      %135 = vector.broadcast %134 : vector<1x128xf32> to vector<16x128xf32>
      %136 = arith.addf %132, %135 : vector<16x128xf32>
      %137 = arith.addf %136, %112 : vector<16x128xf32>
      %c0_51 = arith.constant 0 : index
      %c0_52 = arith.constant 0 : index
      %c0_53 = arith.constant 0 : index
      %138 = vector.load %arg15[%c0_51, %c0_52, %c0_53] : memref<1x1x128xf32, #tpu.memory_space<vmem>>, vector<1x1x128xf32>
      %139 = vector.shape_cast %138 : vector<1x1x128xf32> to vector<1x128xf32>
      %c0_54 = arith.constant 0 : index
      %c0_55 = arith.constant 0 : index
      %c0_56 = arith.constant 0 : index
      %140 = vector.load %arg16[%c0_54, %c0_55, %c0_56] : memref<1x1x128xf32, #tpu.memory_space<vmem>>, vector<1x1x128xf32>
      %141 = vector.shape_cast %140 : vector<1x1x128xf32> to vector<1x128xf32>
      %142 = tpu.iota {dimensions = array<i32: 1>} : vector<1x128xi32>
      %c32_i32_57 = arith.constant 32 : i32
      %143 = vector.broadcast %c32_i32_57 : i32 to vector<1x128xi32>
      %144 = arith.cmpi slt, %142, %143 : vector<1x128xi32>
      %145 = arith.extui %144 : vector<1x128xi1> to vector<1x128xi32>
      %146 = arith.sitofp %145 : vector<1x128xi32> to vector<1x128xf32>
      %147 = vector.broadcast %146 : vector<1x128xf32> to vector<16x128xf32>
      %148 = arith.mulf %137, %147 : vector<16x128xf32>
      %cst_58 = arith.constant dense<0.000000e+00> : vector<16xf32>
      %149 = vector.multi_reduction <add>, %148, %cst_58 [1] : vector<16x128xf32> to vector<16xf32>
      %150 = vector.shape_cast %149 : vector<16xf32> to vector<16x1xf32>
      %cst_59 = arith.constant 3.125000e-02 : f32
      %151 = vector.broadcast %cst_59 : f32 to vector<16x1xf32>
      %152 = arith.mulf %150, %151 : vector<16x1xf32>
      %153 = vector.broadcast %152 : vector<16x1xf32> to vector<16x128xf32>
      %154 = arith.subf %137, %153 : vector<16x128xf32>
      %155 = vector.broadcast %146 : vector<1x128xf32> to vector<16x128xf32>
      %156 = arith.mulf %154, %155 : vector<16x128xf32>
      %157 = arith.mulf %156, %156 : vector<16x128xf32>
      %cst_60 = arith.constant dense<0.000000e+00> : vector<16xf32>
      %158 = vector.multi_reduction <add>, %157, %cst_60 [1] : vector<16x128xf32> to vector<16xf32>
      %159 = vector.shape_cast %158 : vector<16xf32> to vector<16x1xf32>
      %cst_61 = arith.constant 3.125000e-02 : f32
      %160 = vector.broadcast %cst_61 : f32 to vector<16x1xf32>
      %161 = arith.mulf %159, %160 : vector<16x1xf32>
      %cst_62 = arith.constant 9.99999974E-6 : f32
      %162 = vector.broadcast %cst_62 : f32 to vector<16x1xf32>
      %163 = arith.addf %161, %162 : vector<16x1xf32>
      %164 = math.rsqrt %163 : vector<16x1xf32>
      %165 = vector.broadcast %164 : vector<16x1xf32> to vector<16x128xf32>
      %166 = arith.mulf %156, %165 : vector<16x128xf32>
      %167 = vector.broadcast %139 : vector<1x128xf32> to vector<16x128xf32>
      %168 = arith.mulf %166, %167 : vector<16x128xf32>
      %169 = vector.broadcast %141 : vector<1x128xf32> to vector<16x128xf32>
      %170 = arith.addf %168, %169 : vector<16x128xf32>
      %c0_63 = arith.constant 0 : index
      %c0_64 = arith.constant 0 : index
      %171 = vector.load %arg18[%c0_63, %c0_64] : memref<16x128xf32, #tpu.memory_space<vmem>>, vector<16x128xf32>
      tpu.vector_store %arg18[%c0_63, %c0_64], %170 {strides = array<i32>} : memref<16x128xf32, #tpu.memory_space<vmem>>, vector<16x128xf32>,
      %c0_65 = arith.constant 0 : index
      %c0_66 = arith.constant 0 : index
      %c0_67 = arith.constant 0 : index
      %172 = vector.load %arg17[%c0_65, %c0_66, %c0_67] : memref<1x16x128xf32, #tpu.memory_space<vmem>>, vector<1x16x128xf32>
      %173 = vector.shape_cast %172 : vector<1x16x128xf32> to vector<16x128xf32>
      %174 = vector.shape_cast %170 : vector<16x128xf32> to vector<1x16x128xf32>
      tpu.vector_store %arg17[%c0_65, %c0_66, %c0_67], %174 {strides = array<i32>} : memref<1x16x128xf32, #tpu.memory_space<vmem>>, vector<1x16x128xf32>,
    } else {
    }
    return
  }
  func.func @transform_0(%arg0: i32) -> (i32, i32) {
    %c0_i32 = arith.constant 0 : i32
    %c0_i32_0 = arith.constant 0 : i32
    %c0_i32_1 = arith.constant 0 : i32
    return %c0_i32, %c0_i32_0 : i32, i32
  }
  func.func @transform_1(%arg0: i32) -> (i32, i32) {
    %c0_i32 = arith.constant 0 : i32
    %c0_i32_0 = arith.constant 0 : i32
    %c0_i32_1 = arith.constant 0 : i32
    return %c0_i32, %c0_i32_0 : i32, i32
  }
  func.func @transform_2(%arg0: i32) -> (i32, i32) {
    %c0_i32 = arith.constant 0 : i32
    %c0_i32_0 = arith.constant 0 : i32
    %c0_i32_1 = arith.constant 0 : i32
    return %c0_i32, %c0_i32_0 : i32, i32
  }
  func.func @transform_3(%arg0: i32) -> (i32, i32) {
    %c0_i32 = arith.constant 0 : i32
    %c0_i32_0 = arith.constant 0 : i32
    %c0_i32_1 = arith.constant 0 : i32
    return %c0_i32, %c0_i32_0 : i32, i32
  }
  func.func @transform_4(%arg0: i32) -> (i32, i32, i32) {
    %c1_i32 = arith.constant 1 : i32
    %0 = arith.subi %arg0, %c1_i32 : i32
    %c0_i32 = arith.constant 0 : i32
    %1 = arith.maxsi %0, %c0_i32 : i32
    %c0_i32_0 = arith.constant 0 : i32
    %c0_i32_1 = arith.constant 0 : i32
    %c0_i32_2 = arith.constant 0 : i32
    return %1, %c0_i32_0, %c0_i32_1 : i32, i32, i32
  }
  func.func @transform_5(%arg0: i32) -> (i32, i32, i32) {
    %c1_i32 = arith.constant 1 : i32
    %0 = arith.subi %arg0, %c1_i32 : i32
    %c0_i32 = arith.constant 0 : i32
    %1 = arith.maxsi %0, %c0_i32 : i32
    %c0_i32_0 = arith.constant 0 : i32
    %c0_i32_1 = arith.constant 0 : i32
    %c0_i32_2 = arith.constant 0 : i32
    return %1, %c0_i32_0, %c0_i32_1 : i32, i32, i32
  }
  func.func @transform_6(%arg0: i32) -> (i32, i32, i32) {
    %c1_i32 = arith.constant 1 : i32
    %0 = arith.subi %arg0, %c1_i32 : i32
    %c0_i32 = arith.constant 0 : i32
    %1 = arith.maxsi %0, %c0_i32 : i32
    %c0_i32_0 = arith.constant 0 : i32
    %c0_i32_1 = arith.constant 0 : i32
    %c0_i32_2 = arith.constant 0 : i32
    return %1, %c0_i32_0, %c0_i32_1 : i32, i32, i32
  }
  func.func @transform_7(%arg0: i32) -> (i32, i32, i32) {
    %c1_i32 = arith.constant 1 : i32
    %0 = arith.subi %arg0, %c1_i32 : i32
    %c0_i32 = arith.constant 0 : i32
    %1 = arith.maxsi %0, %c0_i32 : i32
    %c0_i32_0 = arith.constant 0 : i32
    %c0_i32_1 = arith.constant 0 : i32
    %c0_i32_2 = arith.constant 0 : i32
    return %1, %c0_i32_0, %c0_i32_1 : i32, i32, i32
  }
  func.func @transform_8(%arg0: i32) -> (i32, i32, i32) {
    %c1_i32 = arith.constant 1 : i32
    %0 = arith.subi %arg0, %c1_i32 : i32
    %c0_i32 = arith.constant 0 : i32
    %1 = arith.maxsi %0, %c0_i32 : i32
    %c0_i32_0 = arith.constant 0 : i32
    %c0_i32_1 = arith.constant 0 : i32
    %c0_i32_2 = arith.constant 0 : i32
    return %1, %c0_i32_0, %c0_i32_1 : i32, i32, i32
  }
  func.func @transform_9(%arg0: i32) -> (i32, i32, i32) {
    %c1_i32 = arith.constant 1 : i32
    %0 = arith.subi %arg0, %c1_i32 : i32
    %c0_i32 = arith.constant 0 : i32
    %1 = arith.maxsi %0, %c0_i32 : i32
    %c0_i32_0 = arith.constant 0 : i32
    %c0_i32_1 = arith.constant 0 : i32
    %c0_i32_2 = arith.constant 0 : i32
    return %1, %c0_i32_0, %c0_i32_1 : i32, i32, i32
  }
  func.func @transform_10(%arg0: i32) -> (i32, i32, i32) {
    %c1_i32 = arith.constant 1 : i32
    %0 = arith.subi %arg0, %c1_i32 : i32
    %c0_i32 = arith.constant 0 : i32
    %1 = arith.maxsi %0, %c0_i32 : i32
    %c0_i32_0 = arith.constant 0 : i32
    %c0_i32_1 = arith.constant 0 : i32
    %c0_i32_2 = arith.constant 0 : i32
    return %1, %c0_i32_0, %c0_i32_1 : i32, i32, i32
  }
  func.func @transform_11(%arg0: i32) -> (i32, i32, i32) {
    %c1_i32 = arith.constant 1 : i32
    %0 = arith.subi %arg0, %c1_i32 : i32
    %c0_i32 = arith.constant 0 : i32
    %1 = arith.maxsi %0, %c0_i32 : i32
    %c0_i32_0 = arith.constant 0 : i32
    %c0_i32_1 = arith.constant 0 : i32
    %c0_i32_2 = arith.constant 0 : i32
    return %1, %c0_i32_0, %c0_i32_1 : i32, i32, i32
  }
  func.func @transform_12(%arg0: i32) -> (i32, i32, i32) {
    %c1_i32 = arith.constant 1 : i32
    %0 = arith.subi %arg0, %c1_i32 : i32
    %c0_i32 = arith.constant 0 : i32
    %1 = arith.maxsi %0, %c0_i32 : i32
    %c0_i32_0 = arith.constant 0 : i32
    %c0_i32_1 = arith.constant 0 : i32
    %c0_i32_2 = arith.constant 0 : i32
    return %1, %c0_i32_0, %c0_i32_1 : i32, i32, i32
  }
  func.func @transform_13(%arg0: i32) -> (i32, i32, i32) {
    %c1_i32 = arith.constant 1 : i32
    %0 = arith.subi %arg0, %c1_i32 : i32
    %c0_i32 = arith.constant 0 : i32
    %1 = arith.maxsi %0, %c0_i32 : i32
    %c0_i32_0 = arith.constant 0 : i32
    %c0_i32_1 = arith.constant 0 : i32
    %c0_i32_2 = arith.constant 0 : i32
    return %1, %c0_i32_0, %c0_i32_1 : i32, i32, i32
  }
  func.func @transform_14(%arg0: i32) -> (i32, i32, i32) {
    %c1_i32 = arith.constant 1 : i32
    %0 = arith.subi %arg0, %c1_i32 : i32
    %c0_i32 = arith.constant 0 : i32
    %1 = arith.maxsi %0, %c0_i32 : i32
    %c0_i32_0 = arith.constant 0 : i32
    %c0_i32_1 = arith.constant 0 : i32
    %c0_i32_2 = arith.constant 0 : i32
    return %1, %c0_i32_0, %c0_i32_1 : i32, i32, i32
  }
  func.func @transform_15(%arg0: i32) -> (i32, i32, i32) {
    %c1_i32 = arith.constant 1 : i32
    %0 = arith.subi %arg0, %c1_i32 : i32
    %c0_i32 = arith.constant 0 : i32
    %1 = arith.maxsi %0, %c0_i32 : i32
    %c0_i32_0 = arith.constant 0 : i32
    %c0_i32_1 = arith.constant 0 : i32
    %c0_i32_2 = arith.constant 0 : i32
    return %1, %c0_i32_0, %c0_i32_1 : i32, i32, i32
  }
  func.func @transform_16(%arg0: i32) -> (i32, i32, i32) {
    %c0_i32 = arith.constant 0 : i32
    %c0_i32_0 = arith.constant 0 : i32
    %c0_i32_1 = arith.constant 0 : i32
    return %arg0, %c0_i32, %c0_i32_0 : i32, i32, i32
  }
}

</mosaic_0001>

<bundles_post_ra>
// kernel: tpu_custom_call.1
= control target key start
LH: loop header
LB: loop body
LE: loop exit
PB: predicated region body
PF: predicated region fallthrough
CT: control target
= control target key end

     0   :  { %s4463_s0 = inlined_call_operand.hbm [shape: f32[16,128], index: 0, kind: input, shape index: {}]   ;;  %s4464_s1 = inlined_call_operand.hbm [shape: f32[16,16], index: 1, kind: input, shape index: {}]   ;;  %s4465_s2 = inlined_call_operand.hbm [shape: f32[1,128], index: 2, kind: input, shape index: {}]   ;;  %s4466_s3 = inlined_call_operand.hbm [shape: f32[1,128], index: 3, kind: input, shape index: {}]   ;;  %s4467_s4 = inlined_call_operand.hbm [shape: bf16[2,128,384], index: 4, kind: input, shape index: {}]   ;;  %s4468_s5 = inlined_call_operand.vmem [shape: f32[2,1,384], index: 5, kind: input, shape index: {}]   ;;  %s4469_s6 = inlined_call_operand.hbm [shape: bf16[2,128,128], index: 6, kind: input, shape index: {}]   ;;  %s4470_s7 = inlined_call_operand.vmem [shape: f32[2,1,128], index: 7, kind: input, shape index: {}]   ;;  %s4471_s8 = inlined_call_operand.vmem [shape: f32[2,1,128], index: 8, kind: input, shape index: {}]   ;;  %s4472_s9 = inlined_call_operand.vmem [shape: f32[2,1,128], index: 9, kind: input, shape index: {}]   ;;  %s4473_s10 = inlined_call_operand.hbm [shape: bf16[2,128,128], index: 10, kind: input, shape index: {}]   ;;  %s4474_s11 = inlined_call_operand.vmem [shape: f32[2,1,128], index: 11, kind: input, shape index: {}]   ;;  %s4475_s12 = inlined_call_operand.hbm [shape: bf16[2,128,128], index: 12, kind: input, shape index: {}]   ;;  %s4476_s13 = inlined_call_operand.vmem [shape: f32[2,1,128], index: 13, kind: input, shape index: {}]   ;;  %s4477_s14 = inlined_call_operand.vmem [shape: f32[2,1,128], index: 14, kind: input, shape index: {}]   ;;  %s4478_s15 = inlined_call_operand.vmem [shape: f32[2,1,128], index: 15, kind: input, shape index: {}]   ;;  %s4479_s16 = inlined_call_operand.hbm [shape: f32[3,16,128], index: 16, kind: output, shape index: {}]  }
   0x1   :  { %4512 = sst [smem:[#allocation30_spill]] %s4463_s0 }
   0x2   :  { %4513 = sst [smem:[#allocation31_spill]] %s4464_s1 }
   0x3   :  { %4514 = sst [smem:[#allocation32_spill]] %s4465_s2 }
   0x4   :  { %4515 = sst [smem:[#allocation33_spill]] %s4466_s3 }
   0x5   :  { %4516 = sst [smem:[#allocation34_spill]] %s4467_s4 }
   0x6   :  { %4517 = sst [smem:[#allocation35_spill]] %s4468_s5 }
   0x7   :  { %4518 = sst [smem:[#allocation36_spill]] %s4469_s6 }
   0x8   :  { %4519 = sst [smem:[#allocation37_spill]] %s4470_s7 }
   0x9   :  { %4520 = sst [smem:[#allocation38_spill]] %s4471_s8 }
   0xa   :  { %4521 = sst [smem:[#allocation39_spill]] %s4472_s9 }
   0xb   :  { %4522 = sst [smem:[#allocation40_spill]] %s4474_s11 }
   0xc   :  { %4523 = sst [smem:[#allocation41_spill]] %s4476_s13 }
   0xd   :  { %4524 = sst [smem:[#allocation42_spill]] %s4477_s14 }
   0xe   :  { %4525 = sst [smem:[#allocation43_spill]] %s4478_s15 }
   0xf   :  { %4526 = sst [smem:[#allocation44_spill]] %s4479_s16 }
  0x10   :  { %21 = vsyncpa [#allocation4], 0 }
  0x11   :  { %22 = vsyncpa [#allocation7], 0 }
  0x12   :  { %23 = vsyncpa [#allocation10], 0 }
  0x13   :  { %24 = vsyncpa [#allocation5], 0 }
  0x14   :  { %26 = vsyncpa [#allocation5 + $0x1], 0  ;;  %s3766_s21 = smov 0   ;;  %s3768_s22 = smov 0  }
  0x15   :  { %s3770_s23 = smov 0   ;;  %s3772_s24 = smov 0  }
  0x16   :  { %s3774_s25 = smov 0   ;;  %s3776_s26 = smov 0  }
  0x17   :  { %s3778_s27 = smov 0  }
  0x18 LB: > { %4527 = sst [smem:[#allocation21_spill]] %s3631_s21  ;;  %s3800_s28 = sadd.s32 4294967295, %s3655_s27   ;;  %s3655_s27 = sphi %s3778_s27, %s4597_s27   ;;  %s3651_s26 = sphi %s3776_s26, %s4602_s26   ;;  %s3647_s25 = sphi %s3774_s25, %s4604_s25   ;;  %s3643_s24 = sphi %s3772_s24, %s4603_s24   ;;  %s3639_s23 = sphi %s3770_s23, %s4600_s23   ;;  %s3635_s22 = sphi %s3768_s22, %s4599_s22   ;;  %s3631_s21 = sphi %s3766_s21, %s4598_s21  }
  0x19   : > { %4528 = sst [smem:[#allocation22_spill]] %s3635_s22  ;;  %s2636_s29 = sadd.s32 4294967294, %s3655_s27  }
  0x1a   : > { %4529 = sst [smem:[#allocation23_spill]] %s3639_s23  ;;  %p142_p0 = scmp.ne.s32.totalorder %s3647_s25, %s3643_s24 }
  0x1b   : > { %4530 = sst [smem:[#allocation24_spill]] %s3651_s26  ;;  %p4486_p1 = scmp.eq.s32.totalorder %s3800_s28, 0 }
  0x1c   : > { %p517_p2 = scmp.ne.s32.totalorder %s3639_s23, %s3635_s22  ;;  %p518_p3 = scmp.eq.s32.totalorder %s3800_s28, 2 }
  0x1d   : > { %p3810_p4 = por %p4486_p1, %p142_p0  ;;  %p523_p5 = scmp.ne.s32.totalorder %s3635_s22, %s3631_s21 }
  0x1e   : > { %p3816_p6 = por %p518_p3, %p517_p2  ;;  %p524_p7 = scmp.eq.s32.totalorder %s2636_s29, 2 }
  0x1f   : > { %s4531_s30 = scalar_select %p3810_p4, 1, 0 }
  0x20   : > { %s4532_s0 = scalar_select %p3816_p6, 1, 0 }
  0x21   : > { %p2661_p8 = scmp.ge.s32.totalorder %s3655_s27, 1  ;;  %p531_p9 = scmp.lt.s32.totalorder %s3655_s27, 4 }
  0x22   : > { %4533 = sst [smem:[#allocation25_spill]] %s4532_s0  ;;  %p3822_p10 = por %p524_p7, %p523_p5 }
  0x23   : > { %p3827_p12 = pnand %p2661_p8, %p531_p9  ;;  %s3657_s19 = smov [#allocation3]  }
  0x24   : > { %s4534_s17 = scalar_select %p3822_p10, 1, 0 }
  0x25   : > { %s4536_s18 = scalar_select %p3827_p12, 1, 0 }
  0x26   : > { %4535 = sst [smem:[#allocation26_spill]] %s4534_s17  ;;  %s543_s20 = sshll.u32 %s3657_s19, 4  ;;  %s544_s20 = int_to_ptr.vmem [resolvable:$true] %s543_s20 }
  0x27   : > { %p3042_p13 = pneg %p3827_p12  ;;  %s3840_s29 = sadd.s32 1, %s3655_s27  }
  0x28   : > { %4538 = sst [smem:[#allocation27_spill]] %s3840_s29  ;;  %s4539_s16 = sld [smem:[#allocation30_spill]] }
  0x29   : > { %p3835_p0 = pnand %p3042_p13, %p4486_p1 }
  0x2b   : > { %s4537_s24 = scalar_select %p3835_p0, 1, 0 }
  0x2c   : > { %p3851_p5 = pneg %p3835_p0 }
  0x2e   : > { %s3321_s0 = scalar_lea.hbm %s4539_s16, 256 }
  0x2f   : > { %p3322_p3 = scmp.ne.s32.totalorder %s4539_s16, %s3321_s0  ;;  %p3328_p9 = scmp.lt.u32.totalorder %s3321_s0, %s4539_s16 }
  0x30   : > { %s4540_s19 = scalar_select %p3851_p5, 1, 0 }
  0x31   : > { %p3324_p7 = pnand %p3851_p5, %p3322_p3 }
  0x33   : > { %p3325_p8 = pneg %p3324_p7 }
  0x35   : > { %p3330_p13 = pnand %p3328_p9, %p3325_p8 }
  0x37   : > { %3333 = shalt.err (!%p3330_p13)
}
  0x38   : > { %s3334_s21 = scalar_lea.vmem %s544_s20, 256  ;;  %p3342_p10 = scmp.lt.s32.totalorder %s544_s20, %s544_s20 }
  0x39   : > { %p3335_p11 = scmp.ne.s32.totalorder %s544_s20, %s3334_s21  ;;  %p3343_p6 = scmp.lt.s32.totalorder %s3334_s21, %s3334_s21 }
  0x3b   : > { %p3337_p1 = pnand %p3335_p11, %p3851_p5  ;;  %p3344_p4 = por %p3343_p6, %p3342_p10 }
  0x3d   : > { %p3338_p2 = pneg %p3337_p1 }
  0x3f   : > { %p3345_p12 = pnand %p3344_p4, %p3338_p2 }
  0x41   : > { %3348 = shalt.err (!%p3345_p12)
}
  0x42   : > { %s4490_s14 = smov 128   ;;  %s4491_s11 = smov 8  }
  0x43   : > { %3045 = dma.hbm_to_vmem [thread:$0]  (!%p3835_p0), %s4539_s16, 256, %s544_s20, [#allocation4], %s4490_s14, %s4490_s14, %s4491_s11  }
  0x44   : > { %p4541_p1 = scmp.gt.s32.totalorder %s3800_s28, 0  ;;  %s2638_s17 = sadd.s32 4294967295, %s3840_s29 }
  0x45   : > { %s129_s21 = sadd.s32 1, %s3651_s26  ;;  %p124_p4 = scmp.gt.s32.totalorder %s2638_s17, 0 }
  0x46   : > { %s3873_s0 = scalar_select %p4541_p1, %s3800_s28, 0 }
  0x47   : > { %p136_p6 = scmp.ne.s32.totalorder %s3651_s26, %s3647_s25  ;;  %p137_p10 = scmp.eq.s32.totalorder %s3655_s27, 0 }
  0x48   : > { %s504_s5 = ssub.s32 %s3655_s27, %s3840_s29  ;;  %s4606_s17 = smov (!%p124_p4, %s2638_s17), 0 }
  0x49   : > { %p138_p11 = por %p137_p10, %p136_p6  ;;  %p505_p12 = scmp.eq.s32.totalorder %s504_s5, 0 }
  0x4a   : > { %s126_s13 = ssub.s32 %s3873_s0, %s4606_s17  ;;  %s507_s15 = sadd.s32 1, %s3639_s23 }
  0x4b   : > { %p127_p2 = scmp.eq.s32.totalorder %s126_s13, 0  ;;  %p3076_p3 = scmp.lt.s32.totalorder %s3655_s27, 3 }
  0x4c   : > { %s3886_s20 = scalar_select %p505_p12, %s3639_s23, %s507_s15  }
  0x4d   : > { %s3889_s14 = scalar_select %p127_p2, %s3651_s26, %s129_s21  }
  0x4e   : > { %4542 = sst [smem:[#allocation28_spill]] %s3886_s20  ;;  %s592_s11 = sand.u32 1, %s3655_s27  }
  0x4f   : > { %4543 = sst [smem:[#allocation29_spill]] %s3889_s14  ;;  %s594_s16 = sand.u32 1, %s3651_s26  }
  0x50   : > { %s3012_s9 = smul.u32 192, %s594_s16  ;;  %p3894_p7 = pnand %p3076_p3, %p138_p11 }
  0x51   : > { %s3013_s8 = smul.u32 3072, %s3873_s0  ;;  %s4545_s4 = sld [smem:[#allocation34_spill]] }
  0x52   : > { %s4544_s7 = scalar_select %p3894_p7, 1, 0 }
  0x53   : > { %s596_s17 = scalar_lea.vmem [#allocation11], %s3012_s9  ;;  %s3905_s13 = sshll.u32 %s594_s16, 6 }
  0x54   : > { %s606_s21 = sshll.u32 %s596_s17, 4  ;;  %s3907_s15 = scalar_lea.sflag [#allocation4], %s592_s11  ;;  %s3903_s21 = int_to_ptr.vmem [resolvable:$true] %s606_s21 }
  0x55   : > { %p3913_p9 = pneg %p3894_p7 }
  0x57   : > { %s3901_s5 = scalar_lea.hbm %s4545_s4, %s3013_s8  ;;  %s3354_s29 = scalar_lea.hbm %s4545_s4, 6144 }
  0x58   : > { %s3349_s14 = scalar_lea.hbm %s3901_s5, 3072  ;;  %p3355_p4 = scmp.lt.u32.totalorder %s3901_s5, %s4545_s4 }
  0x59   : > { %p3350_p8 = scmp.ne.s32.totalorder %s3901_s5, %s3349_s14  ;;  %p3356_p6 = scmp.lt.u32.totalorder %s3354_s29, %s3349_s14 }
  0x5a   : > { %s4546_s22 = scalar_select %p3913_p9, 1, 0 }
  0x5b   : > { %p3352_p13 = pnand %p3913_p9, %p3350_p8  ;;  %p3357_p10 = por %p3356_p6, %p3355_p4 }
  0x5c   : > { %p3358_p11 = scmp.lt.u32.totalorder %s3349_s14, %s3901_s5 }
  0x5d   : > { %p3353_p1 = pneg %p3352_p13 }
  0x5e   : > { %p3359_p12 = por %p3358_p11, %p3357_p10 }
  0x60   : > { %p3360_p2 = pnand %p3359_p12, %p3353_p1 }
  0x62   : > { %3363 = shalt.err (!%p3360_p2)
}
  0x63   : > { %s3364_s11 = scalar_lea.vmem %s3903_s21, 3072  ;;  %s3660_s8 = smov [#allocation11]  }
  0x64   : > { %p3365_p3 = scmp.ne.s32.totalorder %s3903_s21, %s3364_s11  ;;  %s3369_s9 = sshll.u32 %s3660_s8, 4  ;;  %s3370_s9 = int_to_ptr.vmem [resolvable:$false] %s3369_s9 }
  0x65   : > { %s3371_s17 = scalar_lea.vmem %s3370_s9, 6144  ;;  %p3372_p0 = scmp.lt.s32.totalorder %s3903_s21, %s3370_s9 }
  0x66   : > { %p3367_p8 = pnand %p3365_p3, %p3913_p9  ;;  %p3373_p5 = scmp.lt.s32.totalorder %s3371_s17, %s3364_s11 }
  0x68   : > { %p3368_p13 = pneg %p3367_p8  ;;  %p3374_p4 = por %p3373_p5, %p3372_p0 }
  0x6a   : > { %p3375_p6 = pnand %p3374_p4, %p3368_p13 }
  0x6c   : > { %3378 = shalt.err (!%p3375_p6)
}
  0x6d   : > { %s3661_s14 = smov 192   ;;  %s3662_s29 = smov 12  }
  0x6e   : > { %3058 = dma.hbm_to_vmem [thread:$0]  (!%p3894_p7), %s3901_s5, 3072, %s3903_s21, %s3907_s15, %s3661_s14, %s3661_s14, %s3662_s29  }
  0x6f   : > { %s3938_s16 = sshll.u32 %s3873_s0, 10  ;;  %s4547_s6 = sld [smem:[#allocation36_spill]] }
  0x70   : > { %s633_s17 = scalar_lea.vmem [#allocation12], %s3905_s13 }
  0x71   : > { %s643_s4 = sshll.u32 %s633_s17, 4  ;;  %s3947_s4 = int_to_ptr.vmem [resolvable:$true] %s643_s4 }
  0x75   : > { %s3944_s11 = scalar_lea.hbm %s4547_s6, %s3938_s16  ;;  %s3384_s21 = scalar_lea.hbm %s4547_s6, 2048 }
  0x76   : > { %s3379_s26 = scalar_lea.hbm %s3944_s11, 1024  ;;  %p3385_p10 = scmp.lt.u32.totalorder %s3944_s11, %s4547_s6 }
  0x77   : > { %p3380_p0 = scmp.ne.s32.totalorder %s3944_s11, %s3379_s26  ;;  %p3386_p11 = scmp.lt.u32.totalorder %s3384_s21, %s3379_s26 }
  0x78   : > { %p3388_p2 = scmp.lt.u32.totalorder %s3379_s26, %s3944_s11 }
  0x79   : > { %p3382_p5 = pnand %p3380_p0, %p3913_p9  ;;  %p3387_p12 = por %p3386_p11, %p3385_p10 }
  0x7b   : > { %p3383_p1 = pneg %p3382_p5  ;;  %p3389_p3 = por %p3388_p2, %p3387_p12 }
  0x7d   : > { %p3390_p8 = pnand %p3389_p3, %p3383_p1 }
  0x7f   : > { %3393 = shalt.err (!%p3390_p8)
}
  0x80   : > { %s3394_s8 = scalar_lea.vmem %s3947_s4, 1024  ;;  %s3663_s9 = smov [#allocation12]  }
  0x81   : > { %p3395_p13 = scmp.ne.s32.totalorder %s3947_s4, %s3394_s8  ;;  %s3399_s17 = sshll.u32 %s3663_s9, 4  ;;  %s3400_s17 = int_to_ptr.vmem [resolvable:$false] %s3399_s17 }
  0x82   : > { %s3401_s0 = scalar_lea.vmem %s3400_s17, 2048  ;;  %p3402_p0 = scmp.lt.s32.totalorder %s3947_s4, %s3400_s17 }
  0x83   : > { %p3397_p4 = pnand %p3395_p13, %p3913_p9  ;;  %p3403_p5 = scmp.lt.s32.totalorder %s3401_s0, %s3394_s8 }
  0x85   : > { %p3398_p6 = pneg %p3397_p4  ;;  %p3404_p10 = por %p3403_p5, %p3402_p0 }
  0x87   : > { %p3405_p11 = pnand %p3404_p10, %p3398_p6 }
  0x89   : > { %3408 = shalt.err (!%p3405_p11)
}
  0x8a   : > { %s4505_s26 = smov 64   ;;  %s4507_s5 = smov 4  }
  0x8b   : > { %3061 = dma.hbm_to_vmem [thread:$0]  (!%p3894_p7), %s3944_s11, 1024, %s3947_s4, %s3907_s15, %s4505_s26, %s4505_s26, %s4507_s5  }
  0x8c   : > { %s3666_s21 = smov [#allocation6]   ;;  %s3978_s9 = scalar_lea.hbm %s4473_s10, %s3938_s16 }
  0x8d   : > { %s556_s14 = sshll.u32 %s3666_s21, 4  ;;  %s4548_s1 = sld [smem:[#allocation31_spill]]  ;;  %s557_s14 = int_to_ptr.vmem [resolvable:$true] %s556_s14 }
  0x8e   : > { %p4549_p12 = scmp.ne.s32.totalorder %s4540_s19, 0 }
  0x93   : > { %s3409_s6 = scalar_lea.hbm %s4548_s1, 256 }
  0x94   : > { %p3410_p1 = scmp.ne.s32.totalorder %s4548_s1, %s3409_s6  ;;  %p3416_p8 = scmp.lt.u32.totalorder %s3409_s6, %s4548_s1 }
  0x96   : > { %p3412_p2 = pnand %p3410_p1, %p4549_p12 }
  0x98   : > { %p3413_p3 = pneg %p3412_p2 }
  0x9a   : > { %p3418_p13 = pnand %p3416_p8, %p3413_p3 }
  0x9c   : > { %3421 = shalt.err (!%p3418_p13)
}
  0x9d   : > { %s3422_s21 = scalar_lea.vmem %s557_s14, 256  ;;  %p3430_p5 = scmp.lt.s32.totalorder %s557_s14, %s557_s14 }
  0x9e   : > { %p3423_p4 = scmp.ne.s32.totalorder %s557_s14, %s3422_s21  ;;  %p3431_p10 = scmp.lt.s32.totalorder %s3422_s21, %s3422_s21 }
  0xa0   : > { %p3425_p6 = pnand %p3423_p4, %p4549_p12  ;;  %p3432_p11 = por %p3431_p10, %p3430_p5 }
  0xa2   : > { %p3426_p0 = pneg %p3425_p6 }
  0xa4   : > { %p3433_p7 = pnand %p3432_p11, %p3426_p0 }
  0xa6   : > { %3436 = shalt.err (!%p3433_p7)
}
  0xa7   : > { %p4550_p1 = scmp.ne.s32.totalorder %s4537_s24, 0  ;;  %s4551_s23 = smov 8  }
  0xa8   : > { %s4552_s20 = smov 128   ;;  %s693_s8 = scalar_lea.vmem [#allocation13], %s3905_s13 }
  0xa9   : > { %3048 = dma.hbm_to_vmem [thread:$0]  (!%p4550_p1), %s4548_s1, 256, %s557_s14, [#allocation7], %s4552_s20, %s4552_s20, %s4551_s23  }
  0xaa   : > { %s703_s17 = sshll.u32 %s693_s8, 4  ;;  %s3667_s0 = smov [#allocation8]   ;;  %s4002_s17 = int_to_ptr.vmem [resolvable:$true] %s703_s17 }
  0xab   : > { %s4004_s4 = sshll.u32 %s3667_s0, 4  ;;  %s3437_s11 = scalar_lea.hbm %s3978_s9, 1024  ;;  %s571_s4 = int_to_ptr.vmem [resolvable:$true] %s4004_s4 }
  0xac   : > { %p3438_p7 = scmp.ne.s32.totalorder %s3978_s9, %s3437_s11  ;;  %s3442_s6 = scalar_lea.hbm %s4473_s10, 2048 }
  0xad   : > { %p3443_p8 = scmp.lt.u32.totalorder %s3978_s9, %s4473_s10  ;;  %p3444_p13 = scmp.lt.u32.totalorder %s3442_s6, %s3437_s11 }
  0xae   : > { %p3440_p2 = pnand %p3438_p7, %p3913_p9  ;;  %p3446_p6 = scmp.lt.u32.totalorder %s3437_s11, %s3978_s9 }
  0xaf   : > { %p3445_p4 = por %p3444_p13, %p3443_p8 }
  0xb0   : > { %p3441_p3 = pneg %p3440_p2 }
  0xb1   : > { %p3447_p0 = por %p3446_p6, %p3445_p4 }
  0xb3   : > { %p3448_p5 = pnand %p3447_p0, %p3441_p3 }
  0xb5   : > { %3451 = shalt.err (!%p3448_p5)
}
  0xb6   : > { %s3452_s14 = scalar_lea.vmem %s4002_s17, 1024  ;;  %s3668_s23 = smov [#allocation13]  }
  0xb7   : > { %p3453_p10 = scmp.ne.s32.totalorder %s4002_s17, %s3452_s14  ;;  %s3457_s20 = sshll.u32 %s3668_s23, 4  ;;  %s3458_s20 = int_to_ptr.vmem [resolvable:$false] %s3457_s20 }
  0xb8   : > { %s3459_s26 = scalar_lea.vmem %s3458_s20, 2048  ;;  %p3460_p2 = scmp.lt.s32.totalorder %s4002_s17, %s3458_s20 }
  0xb9   : > { %p3455_p11 = pnand %p3453_p10, %p3913_p9  ;;  %p3461_p1 = scmp.lt.s32.totalorder %s3459_s26, %s3452_s14 }
  0xbb   : > { %p3456_p7 = pneg %p3455_p11  ;;  %p3462_p8 = por %p3461_p1, %p3460_p2 }
  0xbd   : > { %p3463_p13 = pnand %p3462_p8, %p3456_p7 }
  0xbf   : > { %3466 = shalt.err (!%p3463_p13)
}
  0xc0   : > { %p4553_p3 = scmp.ne.s32.totalorder %s4544_s7, 0  ;;  %s4554_s5 = smov 4  }
  0xc1   : > { %s4555_s8 = smov 64   ;;  %s4556_s2 = sld [smem:[#allocation32_spill]] }
  0xc2   : > { %3064 = dma.hbm_to_vmem [thread:$0]  (!%p4553_p3), %s3978_s9, 1024, %s4002_s17, %s3907_s15, %s4555_s8, %s4555_s8, %s4554_s5  }
  0xc7   : > { %s3467_s21 = scalar_lea.hbm %s4556_s2, 16 }
  0xc8   : > { %p3468_p1 = scmp.ne.s32.totalorder %s4556_s2, %s3467_s21  ;;  %p3474_p0 = scmp.lt.u32.totalorder %s3467_s21, %s4556_s2 }
  0xca   : > { %p3470_p4 = pnand %p3468_p1, %p4549_p12 }
  0xcc   : > { %p3471_p6 = pneg %p3470_p4 }
  0xce   : > { %p3476_p5 = pnand %p3474_p0, %p3471_p6 }
  0xd0   : > { %3479 = shalt.err (!%p3476_p5)
}
  0xd1   : > { %s3480_s20 = scalar_lea.vmem %s571_s4, 16  ;;  %s3487_s9 = scalar_lea.vmem %s571_s4, 32 }
  0xd2   : > { %p3481_p10 = scmp.ne.s32.totalorder %s571_s4, %s3480_s20  ;;  %p3488_p2 = scmp.lt.s32.totalorder %s571_s4, %s571_s4 }
  0xd3   : > { %p3489_p8 = scmp.lt.s32.totalorder %s3487_s9, %s3480_s20 }
  0xd4   : > { %p3483_p11 = pnand %p3481_p10, %p4549_p12 }
  0xd5   : > { %p3490_p13 = por %p3489_p8, %p3488_p2 }
  0xd6   : > { %p3484_p7 = pneg %p3483_p11 }
  0xd8   : > { %p3491_p3 = pnand %p3490_p13, %p3484_p7 }
  0xda   : > { %3494 = shalt.err (!%p3491_p3)
}
  0xdb   : > { %p4557_p1 = scmp.ne.s32.totalorder %s4537_s24, 0  ;;  %s3669_s0 = smov [#allocation9]  }
  0xdc   : > { %s581_s11 = sshll.u32 %s3669_s0, 4  ;;  %s4054_s6 = scalar_lea.hbm %s4475_s12, %s3938_s16  ;;  %s582_s11 = int_to_ptr.vmem [resolvable:$true] %s581_s11 }
  0xdd   : > { %3051 = dma.hbm_to_vmem [thread:$0]  (!%p4557_p1), %s4556_s2, 16, %s571_s4, [#allocation7]  }
  0xde   : > { %s4558_s3 = sld [smem:[#allocation33_spill]] }
  0xe4   : > { %s3495_s20 = scalar_lea.hbm %s4558_s3, 16 }
  0xe5   : > { %p3496_p3 = scmp.ne.s32.totalorder %s4558_s3, %s3495_s20  ;;  %p3502_p0 = scmp.lt.u32.totalorder %s3495_s20, %s4558_s3 }
  0xe7   : > { %p3498_p4 = pnand %p3496_p3, %p4549_p12 }
  0xe9   : > { %p3499_p6 = pneg %p3498_p4 }
  0xeb   : > { %p3504_p5 = pnand %p3502_p0, %p3499_p6 }
  0xed   : > { %3507 = shalt.err (!%p3504_p5)
}
  0xee   : > { %s3508_s26 = scalar_lea.vmem %s582_s11, 16  ;;  %s3515_s16 = scalar_lea.vmem %s582_s11, 32 }
  0xef   : > { %p3509_p10 = scmp.ne.s32.totalorder %s582_s11, %s3508_s26  ;;  %p3516_p2 = scmp.lt.s32.totalorder %s582_s11, %s582_s11 }
  0xf0   : > { %p3517_p8 = scmp.lt.s32.totalorder %s3515_s16, %s3508_s26 }
  0xf1   : > { %p3511_p11 = pnand %p3509_p10, %p4549_p12 }
  0xf2   : > { %p3518_p13 = por %p3517_p8, %p3516_p2 }
  0xf3   : > { %p3512_p7 = pneg %p3511_p11 }
  0xf5   : > { %p3519_p9 = pnand %p3518_p13, %p3512_p7 }
  0xf7   : > { %3522 = shalt.err (!%p3519_p9)
}
  0xf8   : > { %3054 = dma.hbm_to_vmem [thread:$0]  (!%p4557_p1), %s4558_s3, 16, %s582_s11, [#allocation10]  }
  0xf9   : > { %s729_s19 = scalar_lea.vmem [#allocation14], %s3905_s13  ;;  %s3523_s29 = scalar_lea.hbm %s4054_s6, 1024 }
  0xfa   : > { %s739_s21 = sshll.u32 %s729_s19, 4  ;;  %p3524_p12 = scmp.ne.s32.totalorder %s4054_s6, %s3523_s29  ;;  %s4075_s21 = int_to_ptr.vmem [resolvable:$true] %s739_s21 }
  0xfb   : > { %p4559_p3 = scmp.ne.s32.totalorder %s4546_s22, 0  ;;  %s3528_s23 = scalar_lea.hbm %s4475_s12, 2048 }
  0xfc   : > { %p3529_p6 = scmp.lt.u32.totalorder %s4054_s6, %s4475_s12  ;;  %p3530_p0 = scmp.lt.u32.totalorder %s3528_s23, %s3523_s29 }
  0xfd   : > { %p3526_p9 = pnand %p3524_p12, %p4559_p3  ;;  %p3532_p1 = scmp.lt.u32.totalorder %s3523_s29, %s4054_s6 }
  0xfe   : > { %p3531_p5 = por %p3530_p0, %p3529_p6 }
  0xff   : > { %p3527_p4 = pneg %p3526_p9 }
 0x100   : > { %p3533_p10 = por %p3532_p1, %p3531_p5 }
 0x102   : > { %p3534_p11 = pnand %p3533_p10, %p3527_p4 }
 0x104   : > { %3537 = shalt.err (!%p3534_p11)
}
 0x105   : > { %s3538_s13 = scalar_lea.vmem %s4075_s21, 1024  ;;  %s3670_s11 = smov [#allocation14]  }
 0x106   : > { %p3539_p7 = scmp.ne.s32.totalorder %s4075_s21, %s3538_s13  ;;  %s3543_s4 = sshll.u32 %s3670_s11, 4  ;;  %s3544_s4 = int_to_ptr.vmem [resolvable:$false] %s3543_s4 }
 0x107   : > { %s3545_s17 = scalar_lea.vmem %s3544_s4, 2048  ;;  %p3546_p13 = scmp.lt.s32.totalorder %s4075_s21, %s3544_s4 }
 0x108   : > { %p3541_p2 = pnand %p3539_p7, %p4559_p3  ;;  %p3547_p12 = scmp.lt.s32.totalorder %s3545_s17, %s3538_s13 }
 0x10a   : > { %p3542_p8 = pneg %p3541_p2  ;;  %p3548_p9 = por %p3547_p12, %p3546_p13 }
 0x10c   : > { %p3549_p6 = pnand %p3548_p9, %p3542_p8 }
 0x10e   : > { %3552 = shalt.err (!%p3549_p6)
}
 0x10f   : > { %p4560_p4 = scmp.ne.s32.totalorder %s4544_s7, 0  ;;  %p4561_p3 = scmp.ne.s32.totalorder %s4536_s18, 0 }
 0x110   : > { %p4562_p0 = scmp.eq.s32.totalorder (!%p4561_p3), %s3800_s28, 0 }
 0x111   : > { %3067 = dma.hbm_to_vmem [thread:$0]  (!%p4560_p4), %s4054_s6, 1024, %s4075_s21, %s3907_s15, %s4555_s8, %s4555_s8, %s4554_s5  }
 0x112   : > { %787 = sbr.rel (%p4561_p3) target bundleno = 3230 (0xc9e), region = 84 }
 0x119   : > { %3610 = dma.done.wait (%p4562_p0), [#allocation4], 256   ;;  %p4563_p5 = pmov %p4562_p0 }
 0x11a   : > { %p4564_p1 = pmov %p4562_p0 }
 0x11b   : > { %3612 = vsyncadd (%p4563_p5), [#allocation4], 4294967040 }
 0x11c   : > { %3614 = dma.done.wait (%p4564_p1), [#allocation7], 272   ;;  %p4565_p10 = pmov %p4562_p0 }
 0x11d   : > { %p4566_p11 = pmov %p4562_p0 }
 0x11e   : > { %3616 = vsyncadd (%p4565_p10), [#allocation7], 4294967024 }
 0x11f   : > { %3618 = dma.done.wait (%p4566_p11), [#allocation10], 16   ;;  %p4567_p7 = pmov %p4562_p0 }
 0x120   : > { %s805_s7 = sand.u32 1, %s3800_s28   ;;  %s807_s18 = sand.u32 1, %s3647_s25  }
 0x121   : > { %3620 = vsyncadd (%p4567_p7), [#allocation10], 4294967280  ;;  %s3014_s15 = smul.u32 192, %s807_s18  ;;  %s806_s22 = scalar_lea.sflag [#allocation4], %s805_s7 }
 0x122   : > { %p4568_p2 = scmp.ne.s32.totalorder %s4531_s30, 0 }
 0x123   : > { %s4118_s5 = scalar_lea.vmem [#allocation11], %s3014_s15 }
 0x124   : > { %3622 = dma.done.wait (%p4568_p2), %s806_s22, 6144  }
 0x125   : > { %3624 = vsyncadd (%p4568_p2), %s806_s22, 4294961152  ;;  %s4569_s8 = sld [smem:[#allocation22_spill]]  ;;  %s2686_s6 = sshll.u32 %s807_s18, 6 }
 0x126   : > { %s2690_s1 = sadd.s32 4294967295, %s3800_s28  ;;  %s4573_s18 = sld [smem:[#allocation35_spill]] }
 0x127   : > { %p953_p8 = scmp.gt.s32.totalorder %s2690_s1, 0  ;;  %p2691_p13 = scmp.lt.s32.totalorder %s2690_s1, 1 }
 0x128   : > { %s4575_s19 = sld [smem:[#allocation41_spill]]  ;;  %s4576_s14 = sld [smem:[#allocation42_spill]] }
 0x129   : > { %s4608_s1 = smov (!%p953_p8, %s2690_s1), 0  ;;  %s4577_s13 = sld [smem:[#allocation43_spill]] }
 0x12a   : > { %s4610_s1 = smov (!%p2691_p13, %s4608_s1), 1  ;;  %s4164_s4 = scalar_lea.vmem [#allocation12], %s2686_s6 }
 0x12b   : > { %s4511_s26 = sand.u32 1, %s4569_s8   ;;  %s3015_s30 = smul.u32 3, %s4610_s1 }
 0x12c   : > { %s2689_s16 = sshll.u32 %s4511_s26, 4  ;;  %s4574_s26 = sld [smem:[#allocation40_spill]] }
 0x12d   : > { %s4146_s15 = scalar_lea.vmem %s4573_s18, %s3015_s30  ;;  %s4166_s30 = scalar_lea.vmem [#allocation13], %s2686_s6 }
 0x12e   : > { %s1012_s21 = scalar_lea.vmem %s4575_s19, %s4610_s1  ;;  %s1021_s23 = scalar_lea.vmem %s4576_s14, %s4610_s1 }
 0x12f   : > { %s1030_s11 = scalar_lea.vmem %s4577_s13, %s4610_s1  ;;  %s4168_s17 = scalar_lea.vmem [#allocation14], %s2686_s6 }
 0x130   : > { %s4170_s7 = scalar_lea.vmem [#allocation15], %s2689_s16  ;;  %p4578_p12 = scmp.ne.s32.totalorder %s3800_s28, 0 }
 0x131   : > { %v1043_v0 = vlaneseq (!%p4578_p12)  ;;  %v1039_v2 = vld [vmem:[#allocation3] sm:$0xff] (!%p4578_p12)  ;;  %v3671_v3 = vmov (!%p4578_p12), 0.0   ;;  %v1040_v5 = vld [vmem:[#allocation3 + $0x8] sm:$0xff] (!%p4578_p12) }
 0x132   : > { %s1000_s2 = scalar_lea.vmem %s4574_s26, %s4610_s1  ;;  %1038 = sbr.rel (%p4578_p12) target bundleno = 631 (0x277), region = 120  ;;  %v2740_v25 = vld [vmem:[#allocation8] ss:$0 sm:$0xff] (!%p4578_p12)  ;;  %v2741_v27 = vld [vmem:[#allocation9] ss:$0 sm:$0xff] (!%p4578_p12) }
 0x133   : > { %v1044_v1 = vand.u32 (!%p4578_p12), 127, %v1043_v0 }
 0x135   : > { %vm1045_vm0 = vcmp.lt.s32.totalorder (!%p4578_p12), %v1044_v1, 32 }
 0x136   : > { %v2739_v4 = vsel (!%p4578_p12), %vm1045_vm0, 1.0, %v3671_v3 }
 0x137   : > { %v1048_v6 = vmul.f32 (!%p4578_p12), %v2739_v4, %v1039_v2  ;;  %v1049_v7 = vmul.f32 (!%p4578_p12), %v2739_v4, %v1040_v5 }
 0x139   : > { %1050 = vadd.xlane.f32.xlu0 %v1048_v6 }
 0x13d   : > { %1052 = vadd.xlane.f32.xlu0 %v1049_v7 }
 0x1c6   : > { %v1051_v8 = vpop.xlane.xlu0 %1050 }
 0x1c7   : > { %v1054_v9 = vmul.f32 0.03125, %v1051_v8 }
 0x1c9   : > { %v1056_v10 = vsub.f32 %v1039_v2, %v1054_v9 }
 0x1ca   : > { %v1053_v11 = vpop.xlane.xlu0 %1052 }
 0x1cb   : > { %v1055_v12 = vmul.f32 0.03125, %v1053_v11  ;;  %v1058_v13 = vmul.f32 %v2739_v4, %v1056_v10 }
 0x1cd   : > { %v1057_v14 = vsub.f32 %v1040_v5, %v1055_v12  ;;  %v1060_v15 = vmul.f32 %v1058_v13, %v1058_v13 }
 0x1cf   : > { %1062 = vadd.xlane.f32.xlu1 %v1060_v15  ;;  %v1059_v16 = vmul.f32 %v2739_v4, %v1057_v14 }
 0x1d1   : > { %v1061_v17 = vmul.f32 %v1059_v16, %v1059_v16 }
 0x1d3   : > { %1064 = vadd.xlane.f32.xlu1 %v1061_v17 }
 0x25c   : > { %v1063_v18 = vpop.xlane.xlu1 %1062 }
 0x25d   : > { %v1066_v19 = vmul.f32 0.03125, %v1063_v18 }
 0x25f   : > { %v1068_v20 = vadd.f32 1e-05, %v1066_v19 }
 0x260   : > { %v1065_v21 = vpop.xlane.xlu1 %1064 }
 0x261   : > { %3157 = vrsqrt.f32 %v1068_v20  ;;  %v1067_v22 = vmul.f32 0.03125, %v1065_v21 }
 0x263   : > { %v1069_v23 = vadd.f32 1e-05, %v1067_v22 }
 0x265   : > { %3159 = vrsqrt.f32 %v1069_v23 }
 0x26b   : > { %v3158_v24 = vpop.eup %3157 }
 0x26c   : > { %v1072_v26 = vmul.f32 %v3158_v24, %v1058_v13 }
 0x26e   : > { %v1080_v28 = vmul.f32 %v2740_v25, %v1072_v26 }
 0x26f   : > { %v3160_v29 = vpop.eup %3159 }
 0x270   : > { %v1088_v30 = vadd.f32 %v2741_v27, %v1080_v28  ;;  %v1073_v31 = vmul.f32 %v3160_v29, %v1059_v16 }
 0x272   : > { %1090 = vst [vmem:[#allocation2] sm:$0xff] %v1088_v30  ;;  %1092 = vst [vmem:[%s4170_s7] sm:$0xff] %v1088_v30  ;;  %v1081_v32 = vmul.f32 %v2740_v25, %v1073_v31 }
 0x274   : > { %v1089_v33 = vadd.f32 %v2741_v27, %v1081_v32 }
 0x276   : > { %1091 = vst [vmem:[#allocation2 + $0x8] sm:$0xff] %v1089_v33  ;;  %1093 = vst [vmem:[%s4170_s7 + $0x8] sm:$0xff] %v1089_v33 }
 0x277 PF: > { %p2742_p9 = scmp.le.s32.totalorder %s3800_s28, 0 }
 0x278   : > { %v3221_v34 = vld [vmem:[%s4118_s5 + $0x4] ss:$12 sps:$4 sm:$0xff] (!%p2742_p9)   ;;  %v3223_v35 = vld [vmem:[%s4118_s5] ss:$12 sps:$4 sm:$0xff] (!%p2742_p9)   ;;  %v3672_v36 = vmov (!%p2742_p9), 0   ;;  %v3673_v37 = vmov (!%p2742_p9), 0.0   ;;  %v1135_v63 = vlaneseq (!%p2742_p9) }
 0x279   : > { %1097 = sbr.rel (%p2742_p9) target bundleno = 3202 (0xc82), region = 124  ;;  %1310 = vmatprep.mubr.bf16.mxu0 (!%p2742_p9), %v3672_v36  ;;  %2884 = vmatprep.subr.bf16.mxu1 (!%p2742_p9), %v3673_v37  ;;  %v3224_v38 = vld [vmem:[%s4118_s5 + $0x1c] ss:$12 sps:$4 sm:$0xff] (!%p2742_p9)   ;;  %v3226_v39 = vld [vmem:[%s4118_s5 + $0x18] ss:$12 sps:$4 sm:$0xff] (!%p2742_p9)   ;;  %v4202_v57 = vld [vmem:[#allocation2] sm:$0xff] (!%p2742_p9) }
 0x27a   : > { %1278 = vmatprep.subr.bf16.mxu0 (!%p2742_p9), %v3221_v34  ;;  %v3227_v40 = vld [vmem:[%s4118_s5 + $0x34] ss:$12 sps:$4 sm:$0xff] (!%p2742_p9)   ;;  %v3229_v41 = vld [vmem:[%s4118_s5 + $0x30] ss:$12 sps:$4 sm:$0xff] (!%p2742_p9)   ;;  %v3230_v42 = vld [vmem:[%s4118_s5 + $0x4c] ss:$12 sps:$4 sm:$0xff] (!%p2742_p9)  }
 0x27b   : > { %1279 = vmatpush1.bf16.msra.mxu0 (!%p2742_p9), %v3223_v35  ;;  %v3232_v43 = vld [vmem:[%s4118_s5 + $0x48] ss:$12 sps:$4 sm:$0xff] (!%p2742_p9)   ;;  %v3233_v44 = vld [vmem:[%s4118_s5 + $0x64] ss:$12 sps:$4 sm:$0xff] (!%p2742_p9)   ;;  %v3246_v46 = vld [vmem:[%s4118_s5 + $0x20] ss:$12 sps:$4 sm:$0xff] (!%p2742_p9)  }
 0x27c   : > { %1280 = vmatprep.subr.bf16.mxu0 (!%p2742_p9), %v3224_v38  ;;  %v3245_v45 = vld [vmem:[%s4118_s5 + $0x8] ss:$12 sps:$4 sm:$0xff] (!%p2742_p9)   ;;  %v3235_v47 = vld [vmem:[%s4118_s5 + $0x60] ss:$12 sps:$4 sm:$0xff] (!%p2742_p9)   ;;  %v3238_v49 = vld [vmem:[%s4118_s5 + $0x78] ss:$12 sps:$4 sm:$0xff] (!%p2742_p9)  }
 0x27d   : > { %2885 = vmatpush3.bf16.msra.mxu1 (!%p2742_p9), %v3245_v45  ;;  %v3236_v48 = vld [vmem:[%s4118_s5 + $0x7c] ss:$12 sps:$4 sm:$0xff] (!%p2742_p9)   ;;  %v3239_v50 = vld [vmem:[%s4118_s5 + $0x94] ss:$12 sps:$4 sm:$0xff] (!%p2742_p9)   ;;  %v3247_v51 = vld [vmem:[%s4118_s5 + $0x38] ss:$12 sps:$4 sm:$0xff] (!%p2742_p9)  }
 0x27e   : > { %2886 = vmatprep.subr.bf16.mxu1 (!%p2742_p9), %v3673_v37  ;;  %v3248_v52 = vld [vmem:[%s4118_s5 + $0x50] ss:$12 sps:$4 sm:$0xff] (!%p2742_p9)   ;;  %v3242_v54 = vld [vmem:[%s4118_s5 + $0xac] ss:$12 sps:$4 sm:$0xff] (!%p2742_p9)   ;;  %v3249_v55 = vld [vmem:[%s4118_s5 + $0x68] ss:$12 sps:$4 sm:$0xff] (!%p2742_p9)  }
 0x27f   : > { %1281 = vmatpush1.bf16.msra.mxu0 (!%p2742_p9), %v3226_v39  ;;  %v3241_v53 = vld [vmem:[%s4118_s5 + $0x90] ss:$12 sps:$4 sm:$0xff] (!%p2742_p9)   ;;  %v3244_v56 = vld [vmem:[%s4118_s5 + $0xa8] ss:$12 sps:$4 sm:$0xff] (!%p2742_p9)   ;;  %v3250_v59 = vld [vmem:[%s4118_s5 + $0x80] ss:$12 sps:$4 sm:$0xff] (!%p2742_p9)  }
 0x280   : > { %1282 = vmatprep.subr.bf16.mxu0 %v3227_v40  ;;  %v4204_v58 = vld [vmem:[#allocation2 + $0x8] sm:$0xff]  ;;  %v3252_v62 = vld [vmem:[%s4118_s5 + $0xb0] ss:$12 sps:$4 sm:$0xff]   ;;  %vm3674_vm1 = vmmov 0   ;;  %v1136_v0 = vshrl.u32 %v1135_v63, 7  ;;  %vm1436_vm2 = vcmask 261120  }
 0x281   : > { %2887 = vmatpush3.bf16.msra.mxu1 %v3246_v46  ;;  %v1100_v60 = vpack.c.bf16 %v4204_v58, %v4202_v57  ;;  %v3251_v61 = vld [vmem:[%s4118_s5 + $0x98] ss:$12 sps:$4 sm:$0xff]   ;;  %2900 = vmatprep.mubr.msk.bf16.mxu1 %vm3674_vm1, %v3673_v37  ;;  %v1133_v2 = vld [vmem:[%s4146_s15] sm:$0x7]  ;;  %s3675_s3 = smov 64   ;;  %s3676_s5 = smov 96  }
 0x282   : > { %2888 = vmatprep.subr.bf16.mxu1 %v3673_v37  ;;  %v1137_v1 = vsub.s32 0, %v1136_v0  ;;  %v1141_v3 = vsub.s32 1, %v1136_v0  ;;  %s3677_s6 = smov 32   ;;  %v1145_v23 = vsub.s32 2, %v1136_v0  ;;  %vm1625_vm3 = vcmask 130048   ;;  %s4579_s29 = sld [smem:[#allocation37_spill]] }
 0x283   : > { %1283 = vmatpush1.bf16.msra.mxu0 %v3229_v41  ;;  %vm1920_vm4 = vcmask 523264   ;;  %vm1923_vm5 = vcmask 785408   ;;  %s4581_s15 = sld [smem:[#allocation38_spill]]  ;;  %s4583_s19 = sld [smem:[#allocation39_spill]] }
 0x284   : > { %1284 = vmatprep.subr.bf16.mxu0 %v3230_v42  ;;  %v1138_v4 = vrot.slane %v1133_v2, %v1137_v1  ;;  %v1142_v6 = vrot.slane %v1133_v2, %v1141_v3  ;;  %v1146_v24 = vrot.slane %v1133_v2, %v1145_v23 }
 0x285   : > { %2889 = vmatpush3.bf16.msra.mxu1 %v3247_v51 }
 0x286   : > { %2890 = vmatprep.subr.bf16.mxu1 %v3673_v37 }
 0x287   : > { %1285 = vmatpush1.bf16.msra.mxu0 %v3232_v43 }
 0x288   : > { %1286 = vmatprep.subr.bf16.mxu0 %v3233_v44  ;;  %s4580_s20 = scalar_lea.vmem %s4579_s29, %s4610_s1 }
 0x289   : > { %2891 = vmatpush3.bf16.msra.mxu1 %v3248_v52  ;;  %s4582_s22 = scalar_lea.vmem %s4581_s15, %s4610_s1  ;;  %s4584_s24 = scalar_lea.vmem %s4583_s19, %s4610_s1 }
 0x28a   : > { %2892 = vmatprep.subr.bf16.mxu1 %v3673_v37 }
 0x28b   : > { %1287 = vmatpush1.bf16.msra.mxu0 %v3235_v47 }
 0x28c   : > { %1288 = vmatprep.subr.bf16.mxu0 %v3236_v48 }
 0x28d   : > { %2893 = vmatpush3.bf16.msra.mxu1 %v3249_v55 }
 0x28e   : > { %2894 = vmatprep.subr.bf16.mxu1 %v3673_v37 }
 0x28f   : > { %1289 = vmatpush1.bf16.msra.mxu0 %v3238_v49 }
 0x290   : > { %1290 = vmatprep.subr.bf16.mxu0 %v3239_v50 }
 0x291   : > { %2895 = vmatpush3.bf16.msra.mxu1 %v3250_v59 }
 0x292   : > { %2896 = vmatprep.subr.bf16.mxu1 %v3673_v37 }
 0x293   : > { %1291 = vmatpush1.bf16.msra.mxu0 %v3241_v53 }
 0x294   : > { %1292 = vmatprep.subr.bf16.mxu0 %v3242_v54 }
 0x295   : > { %2897 = vmatpush3.bf16.msra.mxu1 %v3251_v61 }
 0x296   : > { %2898 = vmatprep.subr.bf16.mxu1 %v3673_v37 }
 0x297   : > { %1293 = vmatpush1.bf16.msra.mxu0 %v3244_v56  ;;  %v1434_v56 = vld [vmem:[#allocation6] sm:$0xff] }
 0x298   : > { %2928 = vmatprep.subr.bf16.mxu0 %v3673_v37 }
 0x299   : > { %2899 = vmatpush3.bf16.msra.mxu1 %v3252_v62 }
 0x29a   : > { %1311 = vmatmul.mubr.bf16.vlgmr.msra.gmra.mrb[0].mxu0 %v1100_v60  ;;  %2904 = vmatprep.subr.bf16.mxu1 %v3673_v37 }
 0x29b   : > { %2930 = vmatprep.mubr.msk.bf16.mxu0 %vm3674_vm1, %v3673_v37 }
 0x29c   : > { %2901 = vmatmul.mubr.bf16.vlgmr.msra.gmra.mrb[0].mxu1 %v1100_v60  ;;  %v1435_v60 = vld [vmem:[#allocation6 + $0x8] sm:$0xff] }
 0x29d   : > { %2906 = vmatprep.mubr.msk.bf16.mxu1 %vm3674_vm1, %v3673_v37 }
 0x36d   : > { %v1312_v5 = vpop.f32.mrb[0].mxu0 }
 0x36e   : > { %v1314_v7 = vpop.f32.mrb[1].mxu0  ;;  %v1313_v9 = vadd.f32 %v1312_v5, %v1138_v4 }
 0x36f   : > { %v1316_v8 = vpop.f32.mrb[2].mxu0  ;;  %v1315_v12 = vadd.f32 %v1314_v7, %v1142_v6  ;;  %v1355_v19 = vpop.f32.mrb[0].mxu1 }
 0x370   : > { %v1317_v10 = vadd.f32 %v1316_v8, %v1138_v4  ;;  %v1318_v11 = vpop.f32.mrb[3].mxu0  ;;  %v2902_v20 = vpop.f32.mrb[1].mxu1  ;;  %v4236_v25 = vadd.f32 %v1355_v19, %v1146_v24 }
 0x371   : > { %v1319_v13 = vadd.f32 %v1318_v11, %v1142_v6  ;;  %v1358_v21 = vpop.f32.mrb[2].mxu1 }
 0x372   : > { %v1382_v14 = vpack.c.bf16 %v1317_v10, %v1313_v9  ;;  %v3176_v15 = vpack.i.bf16 %v1317_v10, %v1313_v9  ;;  %v2903_v22 = vpop.f32.mrb[3].mxu1  ;;  %v4238_v26 = vadd.f32 %v1358_v21, %v1146_v24 }
 0x373   : > { %v3171_v16 = vpack.i.bf16 %v1319_v13, %v1315_v12  ;;  %v1406_v17 = vpack.c.bf16 %v1319_v13, %v1315_v12 }
 0x374   : > { %v1430_v27 = vpack.c.bf16 %v4238_v26, %v4236_v25 }
 0x375   : > { %3172 = vrot.lane.b32.xlu1 %v3171_v16, %s3675_s3  ;;  %3162 = vrot.lane.b32.xlu0 %v3171_v16, %s3676_s5  ;;  %v1441_v18 = vsel %vm1436_vm2, %v1406_v17, 0 }
 0x376   : > { %2905 = vmatpush3.bf16.xpose.msra.mxu1 %v1441_v18  ;;  %2929 = vmatpush3.bf16.msra.mxu0 %v1430_v27 }
 0x377   : > { %2910 = vmatprep.subr.bf16.mxu1 %v3673_v37  ;;  %2940 = vmatprep.subr.bf16.mxu0 %v3673_v37 }
 0x379   : > { %3177 = vrot.lane.b32.xlu1 %v3176_v15, %s3675_s3  ;;  %3167 = vrot.lane.b32.xlu0 %v3176_v15, %s3676_s5 }
 0x37d   : > { %3187 = vrot.lane.b32.xlu1 %v3176_v15, %s3677_s6  ;;  %3182 = vrot.lane.b32.xlu0 %v3171_v16, %s3677_s6 }
 0x37e   : > { %2907 = vmatmul.mubr.msk.bf16.vlgmr.msra.gmra.mrb[4].mxu1 %vm1436_vm2, %v1382_v14 }
 0x37f   : > { %2912 = vmatprep.mubr.msk.bf16.mxu1 %vm3674_vm1, %v3673_v37 }
 0x3e7   : > { %v3163_v28 = vpop.permute.xlu0 %3162  ;;  %v3173_v31 = vpop.permute.xlu1 %3172 }
 0x3e8   : > { %v3165_v29 = vunpack.i.h.bf16 %v3163_v28  ;;  %v3164_v30 = vunpack.i.l.bf16 %v3163_v28  ;;  %v3175_v34 = vunpack.i.h.bf16 %v3173_v31  ;;  %v3174_v35 = vunpack.i.l.bf16 %v3173_v31 }
 0x3ea   : > { %v1407_v32 = vpack.c.bf16 %v3165_v29, %v3164_v30  ;;  %v1408_v40 = vpack.c.bf16 %v3175_v34, %v3174_v35  ;;  %v3191_v34 = vpack.i.bf16 %v4238_v26, %v4236_v25 }
 0x3eb   : > { %v3168_v33 = vpop.permute.xlu0 %3167  ;;  %v3178_v43 = vpop.permute.xlu1 %3177 }
 0x3ec   : > { %v1488_v36 = vsel %vm1436_vm2, %v1407_v32, 0  ;;  %v3170_v38 = vunpack.i.h.bf16 %v3168_v33  ;;  %v3169_v39 = vunpack.i.l.bf16 %v3168_v33  ;;  %v1535_v46 = vsel %vm1436_vm2, %v1408_v40, 0 }
 0x3ed   : > { %2911 = vmatpush3.bf16.xpose.msra.mxu1 %v1488_v36  ;;  %v3180_v47 = vunpack.i.h.bf16 %v3178_v43  ;;  %v3179_v48 = vunpack.i.l.bf16 %v3178_v43 }
 0x3ee   : > { %2916 = vmatprep.subr.bf16.mxu1 %v3673_v37  ;;  %v1383_v42 = vpack.c.bf16 %v3170_v38, %v3169_v39 }
 0x3ef   : > { %v3183_v41 = vpop.permute.xlu0 %3182  ;;  %v1384_v50 = vpack.c.bf16 %v3180_v47, %v3179_v48  ;;  %v3188_v51 = vpop.permute.xlu1 %3187 }
 0x3f0   : > { %v3185_v44 = vunpack.i.h.bf16 %v3183_v41  ;;  %v3184_v45 = vunpack.i.l.bf16 %v3183_v41  ;;  %v3190_v53 = vunpack.i.h.bf16 %v3188_v51  ;;  %v3189_v54 = vunpack.i.l.bf16 %v3188_v51 }
 0x3f2   : > { %v1409_v49 = vpack.c.bf16 %v3185_v44, %v3184_v45  ;;  %v1385_v55 = vpack.c.bf16 %v3190_v53, %v3189_v54 }
 0x3f4   : > { %2913 = vmatmul.mubr.msk.bf16.vlgmr.msra.gmra.mrb[8].mxu1 %vm1436_vm2, %v1383_v42  ;;  %v1582_v52 = vsel %vm1436_vm2, %v1409_v49, 0 }
 0x3f5   : > { %2917 = vmatpush3.bf16.xpose.msra.mxu1 %v1535_v46  ;;  %2918 = vmatprep.mubr.msk.bf16.mxu1 %vm3674_vm1, %v3673_v37 }
 0x3f6   : > { %2922 = vmatprep.subr.bf16.mxu1 %v3673_v37 }
 0x3fc   : > { %2919 = vmatmul.mubr.msk.bf16.vlgmr.msra.gmra.mrb[12].mxu1 %vm1436_vm2, %v1384_v50 }
 0x3fd   : > { %2923 = vmatpush3.bf16.xpose.msra.mxu1 %v1582_v52  ;;  %2924 = vmatprep.mubr.msk.bf16.mxu1 %vm3674_vm1, %v3673_v37 }
 0x3fe   : > { %2934 = vmatprep.subr.bf16.mxu1 %v3673_v37 }
 0x404   : > { %2925 = vmatmul.mubr.msk.bf16.vlgmr.msra.gmra.mrb[16].mxu1 %vm1436_vm2, %v1385_v55 }
 0x405   : > { %2936 = vmatprep.mubr.msk.bf16.mxu1 %vm3674_vm1, %v3673_v37 }
 0x451   : > { %v1477_v59 = vpop.f32.mrb[4].mxu1 }
 0x452   : > { %v1478_v61 = vadd.f32 %v1477_v59, %v1434_v56  ;;  %v2908_v62 = vpop.f32.mrb[5].mxu1 }
 0x453   : > { %v1480_v0 = vpop.f32.mrb[6].mxu1 }
 0x454   : > { %v1481_v1 = vadd.f32 %v1480_v0, %v1435_v60  ;;  %v2909_v2 = vpop.f32.mrb[7].mxu1  ;;  %v1626_v3 = vsel %vm1625_vm3, %v1478_v61, -inf }
 0x455   : > { %1627 = vmax.xlane.f32.xlu0 %v1626_v3 }
 0x456   : > { %v1629_v4 = vsel %vm1625_vm3, %v1481_v1, -inf }
 0x457   : > { %1630 = vmax.xlane.f32.xlu1 %v1629_v4 }
 0x4c7   : > { %v1524_v5 = vpop.f32.mrb[8].mxu1 }
 0x4c8   : > { %v1525_v6 = vadd.f32 %v1524_v5, %v1434_v56  ;;  %v2914_v7 = vpop.f32.mrb[9].mxu1 }
 0x4c9   : > { %v1527_v8 = vpop.f32.mrb[10].mxu1 }
 0x4ca   : > { %v1528_v9 = vadd.f32 %v1527_v8, %v1435_v60  ;;  %v2915_v10 = vpop.f32.mrb[11].mxu1  ;;  %v1632_v11 = vsel %vm1625_vm3, %v1525_v6, -inf }
 0x4cb   : > { %1633 = vmax.xlane.f32.xlu0 %v1632_v11 }
 0x4cc   : > { %v1635_v12 = vsel %vm1625_vm3, %v1528_v9, -inf }
 0x4cf   : > { %1636 = vmax.xlane.f32.xlu0 %v1635_v12  ;;  %v1571_v13 = vpop.f32.mrb[12].mxu1 }
 0x4d0   : > { %v1572_v14 = vadd.f32 %v1571_v13, %v1434_v56  ;;  %v2920_v15 = vpop.f32.mrb[13].mxu1 }
 0x4d1   : > { %v1574_v16 = vpop.f32.mrb[14].mxu1 }
 0x4d2   : > { %v1575_v17 = vadd.f32 %v1574_v16, %v1435_v60  ;;  %v2921_v18 = vpop.f32.mrb[15].mxu1  ;;  %v1638_v19 = vsel %vm1625_vm3, %v1572_v14, -inf }
 0x4d3   : > { %1639 = vmax.xlane.f32.xlu1 %v1638_v19 }
 0x4d4   : > { %v1641_v20 = vsel %vm1625_vm3, %v1575_v17, -inf }
 0x4d5   : > { %1642 = vmax.xlane.f32.xlu0 %v1641_v20 }
 0x4d7   : > { %v1618_v21 = vpop.f32.mrb[16].mxu1 }
 0x4d8   : > { %v1619_v22 = vadd.f32 %v1618_v21, %v1434_v56  ;;  %v2926_v23 = vpop.f32.mrb[17].mxu1 }
 0x4d9   : > { %v1621_v24 = vpop.f32.mrb[18].mxu1 }
 0x4da   : > { %v1622_v27 = vadd.f32 %v1621_v24, %v1435_v60  ;;  %v2927_v28 = vpop.f32.mrb[19].mxu1  ;;  %v1644_v29 = vsel %vm1625_vm3, %v1619_v22, -inf }
 0x4db   : > { %1645 = vmax.xlane.f32.xlu1 %v1644_v29 }
 0x4dc   : > { %v1647_v30 = vsel %vm1625_vm3, %v1622_v27, -inf }
 0x4dd   : > { %1648 = vmax.xlane.f32.xlu0 %v1647_v30 }
 0x4e2   : > { %v1628_v38 = vpop.xlane.xlu0 %1627 }
 0x4e3   : > { %v1650_v39 = vsub.f32 %v1478_v61, %v1628_v38 }
 0x4e4   : > { %v1631_v31 = vpop.xlane.xlu1 %1630 }
 0x4e5   : > { %v1651_v32 = vsub.f32 %v1481_v1, %v1631_v31  ;;  %v1658_v40 = vmul.f32 1.442695, %v1650_v39 }
 0x4e7   : > { %v1660_v33 = vmul.f32 1.442695, %v1651_v32 }
 0x4e9   : > { %3277 = vpow2.f32 %v1660_v33 }
 0x4ea   : > { %3279 = vpow2.f32 %v1658_v40 }
 0x4ec   : > { %3192 = vrot.lane.b32.xlu1 %v3191_v34, %s3676_s5 }
 0x4f3   : > { %v4269_v35 = vpop.eup %3277 }
 0x4f4   : > { %v1677_v36 = vsel %vm1625_vm3, %v4269_v35, 0.0  ;;  %v3280_v41 = vpop.eup %3279 }
 0x4f5   : > { %1678 = vadd.xlane.f32.xlu0 %v1677_v36  ;;  %v1674_v42 = vsel %vm1625_vm3, %v3280_v41, 0.0 }
 0x510   : > { %1675 = vadd.xlane.f32.xlu1 %v1674_v42 }
 0x558   : > { %v1634_v43 = vpop.xlane.xlu0 %1633 }
 0x559   : > { %v1652_v44 = vsub.f32 %v1525_v6, %v1634_v43 }
 0x55b   : > { %v1662_v45 = vmul.f32 1.442695, %v1652_v44 }
 0x55c   : > { %v1637_v25 = vpop.xlane.xlu0 %1636 }
 0x55d   : > { %3281 = vpow2.f32 %v1662_v45  ;;  %v1653_v26 = vsub.f32 %v1528_v9, %v1637_v25 }
 0x55f   : > { %v1664_v46 = vmul.f32 1.442695, %v1653_v26 }
 0x560   : > { %v1640_v47 = vpop.xlane.xlu1 %1639 }
 0x561   : > { %3283 = vpow2.f32 %v1664_v46  ;;  %v1654_v48 = vsub.f32 %v1572_v14, %v1640_v47 }
 0x562   : > { %v1643_v49 = vpop.xlane.xlu0 %1642 }
 0x563   : > { %v1666_v50 = vmul.f32 1.442695, %v1654_v48  ;;  %v1655_v51 = vsub.f32 %v1575_v17, %v1643_v49 }
 0x565   : > { %3285 = vpow2.f32 %v1666_v50  ;;  %v1668_v52 = vmul.f32 1.442695, %v1655_v51  ;;  %v3253_v51 = vld [vmem:[%s4164_s4] sm:$0xff]  }
 0x567   : > { %v3282_v53 = vpop.eup %3281  ;;  %3287 = vpow2.f32 %v1668_v52  ;;  %v3254_v52 = vld [vmem:[%s4164_s4 + $0x8] sm:$0xff]  }
 0x568   : > { %v1646_v54 = vpop.xlane.xlu1 %1645  ;;  %v1680_v55 = vsel %vm1625_vm3, %v3282_v53, 0.0 }
 0x569   : > { %v1656_v56 = vsub.f32 %v1619_v22, %v1646_v54  ;;  %1681 = vadd.xlane.f32.xlu1 %v1680_v55 }
 0x56a   : > { %v1649_v59 = vpop.xlane.xlu0 %1648 }
 0x56b   : > { %v3284_v60 = vpop.eup %3283  ;;  %v1670_v61 = vmul.f32 1.442695, %v1656_v56  ;;  %v1657_v62 = vsub.f32 %v1622_v27, %v1649_v59 }
 0x56c   : > { %v3193_v0 = vpop.permute.xlu1 %3192  ;;  %v1683_v1 = vsel %vm1625_vm3, %v3284_v60, 0.0 }
 0x56d   : > { %3289 = vpow2.f32 %v1670_v61  ;;  %v1672_v2 = vmul.f32 1.442695, %v1657_v62  ;;  %v3195_v3 = vunpack.i.h.bf16 %v3193_v0  ;;  %v3194_v4 = vunpack.i.l.bf16 %v3193_v0  ;;  %1684 = vadd.xlane.f32.xlu0 %v1683_v1  ;;  %v3257_v61 = vld [vmem:[%s4164_s4 + $0x20] sm:$0xff]   ;;  %v3258_v62 = vld [vmem:[%s4164_s4 + $0x28] sm:$0xff]  }
 0x56f   : > { %v3286_v5 = vpop.eup %3285  ;;  %3291 = vpow2.f32 %v1672_v2  ;;  %v1431_v6 = vpack.c.bf16 %v3195_v3, %v3194_v4  ;;  %v3259_v3 = vld [vmem:[%s4164_s4 + $0x30] sm:$0xff]  }
 0x570   : > { %v1686_v7 = vsel %vm1625_vm3, %v3286_v5, 0.0 }
 0x571   : > { %v3288_v8 = vpop.eup %3287  ;;  %1687 = vadd.xlane.f32.xlu1 %v1686_v7  ;;  %2935 = vmatpush3.bf16.msra.mxu1 %v1431_v6  ;;  %v3260_v6 = vld [vmem:[%s4164_s4 + $0x38] sm:$0xff]  }
 0x572   : > { %v1689_v9 = vsel %vm1625_vm3, %v3288_v8, 0.0  ;;  %2946 = vmatprep.subr.bf16.mxu1 %v3673_v37 }
 0x573   : > { %1690 = vadd.xlane.f32.xlu0 %v1689_v9 }
 0x577   : > { %v3290_v10 = vpop.eup %3289 }
 0x578   : > { %v1692_v11 = vsel %vm1625_vm3, %v3290_v10, 0.0 }
 0x579   : > { %v3292_v12 = vpop.eup %3291  ;;  %1693 = vadd.xlane.f32.xlu1 %v1692_v11 }
 0x57a   : > { %v1695_v13 = vsel %vm1625_vm3, %v3292_v12, 0.0 }
 0x57b   : > { %1696 = vadd.xlane.f32.xlu0 %v1695_v13 }
 0x582   : > { %v1679_v14 = vpop.xlane.xlu0 %1678 }
 0x583   : > { %3293 = vrcp.f32 %v1679_v14 }
 0x58a   : > { %3202 = vrot.lane.b32.xlu1 %v3191_v34, %s3677_s6 }
 0x58d   : > { %v3294_v16 = vpop.eup %3293 }
 0x58e   : > { %v1707_v18 = vmul.f32 %v3294_v16, %v4269_v35 }
 0x591   : > { %3197 = vrot.lane.b32.xlu0 %v3191_v34, %s3675_s3 }
 0x59d   : > { %v1676_v15 = vpop.xlane.xlu1 %1675 }
 0x59e   : > { %3295 = vrcp.f32 %v1676_v15 }
 0x5a8   : > { %v3296_v17 = vpop.eup %3295 }
 0x5a9   : > { %v1706_v19 = vmul.f32 %v3296_v17, %v3280_v41 }
 0x5ab   : > { %v1714_v20 = vpack.c.bf16 %v1707_v18, %v1706_v19 }
 0x5ad   : > { %2931 = vmatmul.mubr.msk.bf16.vlgmr.msra.gmra.mrb[4].mxu0 %vm1625_vm3, %v1714_v20 }
 0x5ae   : > { %2942 = vmatprep.mubr.msk.bf16.mxu0 %vm3674_vm1, %v3673_v37 }
 0x5f6   : > { %v1682_v21 = vpop.xlane.xlu1 %1681 }
 0x5f7   : > { %3297 = vrcp.f32 %v1682_v21 }
 0x5fa   : > { %v1685_v22 = vpop.xlane.xlu0 %1684 }
 0x5fb   : > { %3299 = vrcp.f32 %v1685_v22 }
 0x5fe   : > { %v1688_v23 = vpop.xlane.xlu1 %1687 }
 0x600   : > { %v1691_v24 = vpop.xlane.xlu0 %1690 }
 0x601   : > { %3301 = vrcp.f32 %v1691_v24  ;;  %v3298_v27 = vpop.eup %3297 }
 0x602   : > { %3303 = vrcp.f32 %v1688_v23  ;;  %v1708_v29 = vmul.f32 %v3298_v27, %v3282_v53  ;;  %v3255_v53 = vld [vmem:[%s4164_s4 + $0x10] sm:$0xff]  }
 0x605   : > { %v3300_v28 = vpop.eup %3299 }
 0x606   : > { %v1709_v30 = vmul.f32 %v3300_v28, %v3284_v60  ;;  %v1694_v31 = vpop.xlane.xlu1 %1693  ;;  %v3256_v60 = vld [vmem:[%s4164_s4 + $0x18] sm:$0xff]  }
 0x607   : > { %3305 = vrcp.f32 %v1694_v31 }
 0x608   : > { %v1697_v32 = vpop.xlane.xlu0 %1696  ;;  %v1715_v33 = vpack.c.bf16 %v1709_v30, %v1708_v29 }
 0x609   : > { %3307 = vrcp.f32 %v1697_v32 }
 0x60a   : > { %v3203_v34 = vpop.permute.xlu1 %3202  ;;  %2937 = vmatmul.mubr.msk.bf16.vlgmr.msra.gmra.mrb[20].mxu1 %vm1625_vm3, %v1715_v33 }
 0x60b   : > { %v3302_v35 = vpop.eup %3301  ;;  %v3205_v36 = vunpack.i.h.bf16 %v3203_v34  ;;  %v3204_v38 = vunpack.i.l.bf16 %v3203_v34  ;;  %2948 = vmatprep.mubr.msk.bf16.mxu1 %vm3674_vm1, %v3673_v37 }
 0x60c   : > { %v3198_v39 = vpop.permute.xlu0 %3197  ;;  %v3304_v40 = vpop.eup %3303  ;;  %v1711_v44 = vmul.f32 %v3302_v35, %v3288_v8  ;;  %v2044_v35 = vand.u32 127, %v1135_v63 }
 0x60d   : > { %v1433_v41 = vpack.c.bf16 %v3205_v36, %v3204_v38  ;;  %v3200_v42 = vunpack.i.h.bf16 %v3198_v39  ;;  %v3199_v43 = vunpack.i.l.bf16 %v3198_v39  ;;  %v1710_v25 = vmul.f32 %v3304_v40, %v3286_v5  ;;  %v2775_v36 = vld [vmem:[%s4580_s20] ss:$0 sm:$0xff] }
 0x60e   : > { %vm2045_vm6 = vcmp.lt.s32.totalorder %v2044_v35, 32 }
 0x60f   : > { %v1432_v45 = vpack.c.bf16 %v3200_v42, %v3199_v43  ;;  %2947 = vmatpush3.bf16.msra.mxu1 %v1433_v41  ;;  %v1716_v46 = vpack.c.bf16 %v1711_v44, %v1710_v25  ;;  %v4328_v41 = vsel %vm2045_vm6, 1.0, %v3673_v37 }
 0x610   : > { %2972 = vmatprep.subr.bf16.mxu1 %v3673_v37 }
 0x611   : > { %v3306_v26 = vpop.eup %3305  ;;  %2941 = vmatpush3.bf16.msra.mxu0 %v1432_v45 }
 0x612   : > { %2952 = vmatprep.subr.bf16.mxu0 %v3673_v37  ;;  %v1712_v48 = vmul.f32 %v3306_v26, %v3290_v10 }
 0x613   : > { %v3308_v47 = vpop.eup %3307 }
 0x614   : > { %v1713_v49 = vmul.f32 %v3308_v47, %v3292_v12  ;;  %2943 = vmatmul.mubr.msk.bf16.vlgmr.msra.gmra.mrb[8].mxu0 %vm1625_vm3, %v1716_v46  ;;  %v3261_v46 = vld [vmem:[%s4166_s30] sm:$0xff]  }
 0x615   : > { %2968 = vmatprep.mubr.msk.bf16.mxu0 %vm3674_vm1, %v3673_v37  ;;  %2953 = vmatpush3.bf16.msra.mxu0 %v3253_v51 }
 0x616   : > { %v1717_v50 = vpack.c.bf16 %v1713_v49, %v1712_v48  ;;  %2954 = vmatprep.subr.bf16.mxu0 %v3673_v37 }
 0x618   : > { %2949 = vmatmul.mubr.msk.bf16.vlgmr.msra.gmra.mrb[24].mxu1 %vm1625_vm3, %v1717_v50 }
 0x619   : > { %2988 = vmatprep.mubr.msk.bf16.mxu1 %vm3674_vm1, %v3673_v37  ;;  %2955 = vmatpush3.bf16.msra.mxu0 %v3254_v52 }
 0x61a   : > { %2956 = vmatprep.subr.bf16.mxu0 %v3673_v37  ;;  %2973 = vmatpush3.bf16.msra.mxu1 %v3261_v46 }
 0x61b   : > { %2974 = vmatprep.subr.bf16.mxu1 %v3673_v37 }
 0x61d   : > { %2957 = vmatpush3.bf16.msra.mxu0 %v3255_v53 }
 0x61e   : > { %2958 = vmatprep.subr.bf16.mxu0 %v3673_v37 }
 0x621   : > { %2959 = vmatpush3.bf16.msra.mxu0 %v3256_v60  ;;  %v3265_v60 = vld [vmem:[%s4166_s30 + $0x20] sm:$0xff]  }
 0x622   : > { %2960 = vmatprep.subr.bf16.mxu0 %v3673_v37 }
 0x625   : > { %2961 = vmatpush3.bf16.msra.mxu0 %v3257_v61  ;;  %v3266_v61 = vld [vmem:[%s4166_s30 + $0x28] sm:$0xff]  }
 0x626   : > { %2962 = vmatprep.subr.bf16.mxu0 %v3673_v37 }
 0x629   : > { %2963 = vmatpush3.bf16.msra.mxu0 %v3258_v62  ;;  %v3267_v62 = vld [vmem:[%s4166_s30 + $0x30] sm:$0xff]  }
 0x62a   : > { %2964 = vmatprep.subr.bf16.mxu0 %v3673_v37 }
 0x62d   : > { %2965 = vmatpush3.bf16.msra.mxu0 %v3259_v3 }
 0x62e   : > { %2966 = vmatprep.subr.bf16.mxu0 %v3673_v37 }
 0x631   : > { %2967 = vmatpush3.bf16.msra.mxu0 %v3260_v6 }
 0x632   : > { %2992 = vmatprep.subr.bf16.mxu0 %v3673_v37 }
 0x680   : > { %v1755_v54 = vpop.f32.mrb[4].mxu0 }
 0x681   : > { %v2932_v55 = vpop.f32.mrb[5].mxu0 }
 0x682   : > { %v1758_v56 = vpop.f32.mrb[6].mxu0  ;;  %v3262_v55 = vld [vmem:[%s4166_s30 + $0x8] sm:$0xff]  }
 0x683   : > { %v2933_v59 = vpop.f32.mrb[7].mxu0  ;;  %2975 = vmatpush3.bf16.msra.mxu1 %v3262_v55 }
 0x684   : > { %2976 = vmatprep.subr.bf16.mxu1 %v3673_v37  ;;  %v3264_v59 = vld [vmem:[%s4166_s30 + $0x18] sm:$0xff]  }
 0x6dd   : > { %v1799_v0 = vpop.f32.mrb[20].mxu1 }
 0x6de   : > { %v2938_v1 = vpop.f32.mrb[21].mxu1 }
 0x6df   : > { %v1802_v2 = vpop.f32.mrb[22].mxu1  ;;  %v3269_v1 = vld [vmem:[%s4168_s17] sm:$0xff]  }
 0x6e0   : > { %v3206_v4 = vpack.i.bf16 %v1802_v2, %v1799_v0  ;;  %v2939_v5 = vpop.f32.mrb[23].mxu1  ;;  %v3268_v0 = vld [vmem:[%s4166_s30 + $0x38] sm:$0xff]   ;;  %v3270_v2 = vld [vmem:[%s4168_s17 + $0x8] sm:$0xff]  }
 0x6e2   : > { %3207 = vrot.lane.b32.xlu1 %v3206_v4, %s3677_s6 }
 0x6e7   : > { %v1843_v7 = vpop.f32.mrb[8].mxu0 }
 0x6e8   : > { %v2944_v8 = vpop.f32.mrb[9].mxu0 }
 0x6e9   : > { %v1846_v9 = vpop.f32.mrb[10].mxu0 }
 0x6ea   : > { %v3211_v10 = vpack.i.bf16 %v1846_v9, %v1843_v7  ;;  %v2945_v11 = vpop.f32.mrb[11].mxu0 }
 0x6eb   : > { %v1887_v12 = vpop.f32.mrb[24].mxu1  ;;  %v2785_v11 = vld [vmem:[%s4582_s22] ss:$0 sm:$0xff] }
 0x6ec   : > { %3212 = vrot.lane.b32.xlu0 %v3211_v10, %s3675_s3  ;;  %v2950_v13 = vpop.f32.mrb[25].mxu1 }
 0x6ed   : > { %v1890_v14 = vpop.f32.mrb[26].mxu1 }
 0x6ee   : > { %v3216_v15 = vpack.i.bf16 %v1890_v14, %v1887_v12  ;;  %v2951_v16 = vpop.f32.mrb[27].mxu1 }
 0x6f0   : > { %3217 = vrot.lane.b32.xlu1 %v3216_v15, %s3676_s5  ;;  %v2786_v15 = vld [vmem:[%s4584_s24] ss:$0 sm:$0xff] }
 0x754   : > { %v3208_v17 = vpop.permute.xlu1 %3207 }
 0x755   : > { %v3210_v19 = vunpack.i.h.bf16 %v3208_v17  ;;  %v3209_v20 = vunpack.i.l.bf16 %v3208_v17 }
 0x757   : > { %v1919_v24 = vsel %vm1436_vm2, %v1758_v56, %v3210_v19  ;;  %v1918_v27 = vsel %vm1436_vm2, %v1755_v54, %v3209_v20  ;;  %v3263_v56 = vld [vmem:[%s4166_s30 + $0x10] sm:$0xff]  }
 0x758   : > { %2977 = vmatpush3.bf16.msra.mxu1 %v3263_v56  ;;  %v3271_v20 = vld [vmem:[%s4168_s17 + $0x10] sm:$0xff]  }
 0x759   : > { %2978 = vmatprep.subr.bf16.mxu1 %v3673_v37 }
 0x75c   : > { %2979 = vmatpush3.bf16.msra.mxu1 %v3264_v59 }
 0x75d   : > { %2980 = vmatprep.subr.bf16.mxu1 %v3673_v37 }
 0x75e   : > { %v3213_v18 = vpop.permute.xlu0 %3212 }
 0x75f   : > { %v3215_v21 = vunpack.i.h.bf16 %v3213_v18  ;;  %v3214_v22 = vunpack.i.l.bf16 %v3213_v18 }
 0x760   : > { %2981 = vmatpush3.bf16.msra.mxu1 %v3265_v60 }
 0x761   : > { %v1921_v30 = vsel %vm1920_vm4, %v1918_v27, %v3214_v22  ;;  %v1922_v31 = vsel %vm1920_vm4, %v1919_v24, %v3215_v21  ;;  %2982 = vmatprep.subr.bf16.mxu1 %v3673_v37  ;;  %v3272_v21 = vld [vmem:[%s4168_s17 + $0x18] sm:$0xff]   ;;  %v3273_v22 = vld [vmem:[%s4168_s17 + $0x20] sm:$0xff]   ;;  %v3275_v24 = vld [vmem:[%s4168_s17 + $0x30] sm:$0xff]  }
 0x762   : > { %v3218_v23 = vpop.permute.xlu1 %3217  ;;  %v3276_v27 = vld [vmem:[%s4168_s17 + $0x38] sm:$0xff]  }
 0x763   : > { %v3220_v28 = vunpack.i.h.bf16 %v3218_v23  ;;  %v3219_v29 = vunpack.i.l.bf16 %v3218_v23  ;;  %v3274_v23 = vld [vmem:[%s4168_s17 + $0x28] sm:$0xff]  }
 0x764   : > { %2983 = vmatpush3.bf16.msra.mxu1 %v3266_v61 }
 0x765   : > { %v1925_v32 = vsel %vm1923_vm5, %v1922_v31, %v3220_v28  ;;  %v1924_v33 = vsel %vm1923_vm5, %v1921_v30, %v3219_v29  ;;  %2984 = vmatprep.subr.bf16.mxu1 %v3673_v37  ;;  %v2787_v28 = vld [vmem:[%s1000_s2] ss:$0 sm:$0xff] }
 0x766   : > { %v1926_v34 = vpack.c.bf16 %v1925_v32, %v1924_v33 }
 0x768   : > { %2969 = vmatmul.mubr.bf16.vlgmr.msra.gmra.mrb[12].mxu0 %v1926_v34  ;;  %2985 = vmatpush3.bf16.msra.mxu1 %v3267_v62 }
 0x769   : > { %3008 = vmatprep.mubr.msk.bf16.mxu0 %vm3674_vm1, %v3673_v37  ;;  %2986 = vmatprep.subr.bf16.mxu1 %v3673_v37 }
 0x76a   : > { %2993 = vmatpush3.bf16.msra.mxu0 %v3269_v1 }
 0x76b   : > { %2994 = vmatprep.subr.bf16.mxu0 %v3673_v37 }
 0x76c   : > { %2987 = vmatpush3.bf16.msra.mxu1 %v3268_v0 }
 0x76e   : > { %2995 = vmatpush3.bf16.msra.mxu0 %v3270_v2 }
 0x76f   : > { %2996 = vmatprep.subr.bf16.mxu0 %v3673_v37 }
 0x772   : > { %2997 = vmatpush3.bf16.msra.mxu0 %v3271_v20 }
 0x773   : > { %2998 = vmatprep.subr.bf16.mxu0 %v3673_v37 }
 0x776   : > { %2999 = vmatpush3.bf16.msra.mxu0 %v3272_v21 }
 0x777   : > { %3000 = vmatprep.subr.bf16.mxu0 %v3673_v37 }
 0x77a   : > { %3001 = vmatpush3.bf16.msra.mxu0 %v3273_v22 }
 0x77b   : > { %3002 = vmatprep.subr.bf16.mxu0 %v3673_v37 }
 0x77e   : > { %3003 = vmatpush3.bf16.msra.mxu0 %v3274_v23 }
 0x77f   : > { %3004 = vmatprep.subr.bf16.mxu0 %v3673_v37 }
 0x782   : > { %3005 = vmatpush3.bf16.msra.mxu0 %v3275_v24 }
 0x783   : > { %3006 = vmatprep.subr.bf16.mxu0 %v3673_v37 }
 0x786   : > { %3007 = vmatpush3.bf16.msra.mxu0 %v3276_v27 }
 0x83b   : > { %v2032_v38 = vpop.f32.mrb[12].mxu0 }
 0x83c   : > { %v2033_v39 = vadd.f32 %v2775_v36, %v2032_v38  ;;  %v2970_v40 = vpop.f32.mrb[13].mxu0 }
 0x83d   : > { %v2035_v42 = vpop.f32.mrb[14].mxu0 }
 0x83e   : > { %v2039_v43 = vadd.f32 %v2033_v39, %v4202_v57  ;;  %v2036_v44 = vadd.f32 %v2775_v36, %v2035_v42  ;;  %v2971_v45 = vpop.f32.mrb[15].mxu0 }
 0x840   : > { %v2040_v63 = vadd.f32 %v2036_v44, %v4204_v58  ;;  %v2048_v25 = vmul.f32 %v4328_v41, %v2039_v43 }
 0x842   : > { %2050 = vadd.xlane.f32.xlu0 %v2048_v25  ;;  %v2049_v26 = vmul.f32 %v4328_v41, %v2040_v63  ;;  %v2796_v25 = vld [vmem:[%s1012_s21] ss:$0 sm:$0xff] }
 0x844   : > { %2052 = vadd.xlane.f32.xlu1 %v2049_v26 }
 0x8cf   : > { %v2051_v47 = vpop.xlane.xlu0 %2050 }
 0x8d0   : > { %v2054_v48 = vmul.f32 0.03125, %v2051_v47 }
 0x8d1   : > { %v2053_v49 = vpop.xlane.xlu1 %2052 }
 0x8d2   : > { %v2056_v57 = vsub.f32 %v2039_v43, %v2054_v48  ;;  %v2055_v50 = vmul.f32 0.03125, %v2053_v49 }
 0x8d4   : > { %v2057_v51 = vsub.f32 %v2040_v63, %v2055_v50  ;;  %v2058_v58 = vmul.f32 %v4328_v41, %v2056_v57 }
 0x8d6   : > { %v2060_v52 = vmul.f32 %v2058_v58, %v2058_v58  ;;  %v2059_v53 = vmul.f32 %v4328_v41, %v2057_v51 }
 0x8d8   : > { %2062 = vadd.xlane.f32.xlu0 %v2060_v52  ;;  %v2061_v54 = vmul.f32 %v2059_v53, %v2059_v53 }
 0x8dc   : > { %2064 = vadd.xlane.f32.xlu0 %v2061_v54 }
 0x965   : > { %v2063_v3 = vpop.xlane.xlu0 %2062 }
 0x966   : > { %v2066_v4 = vmul.f32 0.03125, %v2063_v3 }
 0x968   : > { %v2068_v5 = vadd.f32 1e-05, %v2066_v4 }
 0x969   : > { %v2065_v6 = vpop.xlane.xlu0 %2064 }
 0x96a   : > { %3309 = vrsqrt.f32 %v2068_v5  ;;  %v2067_v7 = vmul.f32 0.03125, %v2065_v6 }
 0x96c   : > { %v2069_v8 = vadd.f32 1e-05, %v2067_v7 }
 0x96e   : > { %3311 = vrsqrt.f32 %v2069_v8 }
 0x974   : > { %v3310_v9 = vpop.eup %3309 }
 0x975   : > { %v2072_v10 = vmul.f32 %v3310_v9, %v2058_v58 }
 0x977   : > { %v2080_v14 = vmul.f32 %v2785_v11, %v2072_v10 }
 0x978   : > { %v3312_v12 = vpop.eup %3311 }
 0x979   : > { %v2073_v13 = vmul.f32 %v3312_v12, %v2059_v53  ;;  %v2088_v17 = vadd.f32 %v2786_v15, %v2080_v14 }
 0x97b   : > { %v2081_v16 = vmul.f32 %v2785_v11, %v2073_v13  ;;  %v2806_v11 = vld [vmem:[%s1030_s11] ss:$0 sm:$0xff] }
 0x97d   : > { %v2089_v18 = vadd.f32 %v2786_v15, %v2081_v16 }
 0x97f   : > { %v2090_v19 = vpack.c.bf16 %v2089_v18, %v2088_v17 }
 0x981   : > { %2989 = vmatmul.mubr.bf16.vlgmr.msra.gmra.mrb[28].mxu1 %v2090_v19 }
 0xa54   : > { %v2196_v29 = vpop.f32.mrb[28].mxu1 }
 0xa55   : > { %v2197_v30 = vadd.f32 %v2787_v28, %v2196_v29  ;;  %v2990_v31 = vpop.f32.mrb[29].mxu1 }
 0xa56   : > { %v2199_v32 = vpop.f32.mrb[30].mxu1 }
 0xa57   : > { %v2205_v33 = vmul.f32 0.70710677, %v2197_v30  ;;  %v2200_v34 = vadd.f32 %v2787_v28, %v2199_v32  ;;  %v2991_v35 = vpop.f32.mrb[31].mxu1  ;;  %v2203_v40 = vmul.f32 0.5, %v2197_v30 }
 0xa59   : > { %3313 = verf.f32 %v2205_v33  ;;  %v2206_v36 = vmul.f32 0.70710677, %v2200_v34  ;;  %v2204_v42 = vmul.f32 0.5, %v2200_v34 }
 0xa5b   : > { %3315 = verf.f32 %v2206_v36 }
 0xa63   : > { %v3314_v38 = vpop.eup %3313 }
 0xa64   : > { %v2209_v37 = vadd.f32 1.0, %v3314_v38 }
 0xa65   : > { %v3316_v39 = vpop.eup %3315 }
 0xa66   : > { %v2210_v43 = vadd.f32 1.0, %v3316_v39  ;;  %v2211_v44 = vmul.f32 %v2209_v37, %v2203_v40 }
 0xa68   : > { %v2212_v45 = vmul.f32 %v2210_v43, %v2204_v42 }
 0xa6a   : > { %v2213_v63 = vpack.c.bf16 %v2212_v45, %v2211_v44 }
 0xa6c   : > { %3009 = vmatmul.mubr.bf16.vlgmr.msra.gmra.mrb[16].mxu0 %v2213_v63 }
 0xb3f   : > { %v2319_v26 = vpop.f32.mrb[16].mxu0 }
 0xb40   : > { %v2320_v46 = vadd.f32 %v2796_v25, %v2319_v26  ;;  %v3010_v47 = vpop.f32.mrb[17].mxu0 }
 0xb41   : > { %v2322_v48 = vpop.f32.mrb[18].mxu0 }
 0xb42   : > { %v2326_v49 = vadd.f32 %v2320_v46, %v2088_v17  ;;  %v2323_v57 = vadd.f32 %v2796_v25, %v2322_v48  ;;  %v3011_v50 = vpop.f32.mrb[19].mxu0 }
 0xb44   : > { %v2327_v51 = vadd.f32 %v2323_v57, %v2089_v18  ;;  %v2330_v58 = vmul.f32 %v4328_v41, %v2326_v49 }
 0xb46   : > { %2332 = vadd.xlane.f32.xlu1 %v2330_v58  ;;  %v2331_v52 = vmul.f32 %v4328_v41, %v2327_v51 }
 0xb48   : > { %2334 = vadd.xlane.f32.xlu0 %v2331_v52 }
 0xbd3   : > { %v2333_v53 = vpop.xlane.xlu1 %2332 }
 0xbd4   : > { %v2336_v54 = vmul.f32 0.03125, %v2333_v53 }
 0xbd5   : > { %v2335_v55 = vpop.xlane.xlu0 %2334 }
 0xbd6   : > { %v2338_v56 = vsub.f32 %v2326_v49, %v2336_v54  ;;  %v2337_v59 = vmul.f32 0.03125, %v2335_v55 }
 0xbd8   : > { %v2339_v60 = vsub.f32 %v2327_v51, %v2337_v59  ;;  %v2340_v61 = vmul.f32 %v4328_v41, %v2338_v56 }
 0xbda   : > { %v2342_v62 = vmul.f32 %v2340_v61, %v2340_v61  ;;  %v2341_v0 = vmul.f32 %v4328_v41, %v2339_v60  ;;  %v2805_v41 = vld [vmem:[%s1021_s23] ss:$0 sm:$0xff] }
 0xbdc   : > { %2344 = vadd.xlane.f32.xlu1 %v2342_v62  ;;  %v2343_v1 = vmul.f32 %v2341_v0, %v2341_v0 }
 0xbde   : > { %2346 = vadd.xlane.f32.xlu0 %v2343_v1 }
 0xc69   : > { %v2345_v2 = vpop.xlane.xlu1 %2344 }
 0xc6a   : > { %v2348_v3 = vmul.f32 0.03125, %v2345_v2 }
 0xc6b   : > { %v2347_v4 = vpop.xlane.xlu0 %2346 }
 0xc6c   : > { %v2350_v5 = vadd.f32 1e-05, %v2348_v3  ;;  %v2349_v6 = vmul.f32 0.03125, %v2347_v4 }
 0xc6e   : > { %3317 = vrsqrt.f32 %v2350_v5  ;;  %v2351_v7 = vadd.f32 1e-05, %v2349_v6 }
 0xc70   : > { %3319 = vrsqrt.f32 %v2351_v7 }
 0xc78   : > { %v3318_v8 = vpop.eup %3317 }
 0xc79   : > { %v2354_v9 = vmul.f32 %v3318_v8, %v2340_v61 }
 0xc7a   : > { %v3320_v10 = vpop.eup %3319 }
 0xc7b   : > { %v2362_v12 = vmul.f32 %v2805_v41, %v2354_v9  ;;  %v2355_v13 = vmul.f32 %v3320_v10, %v2341_v0 }
 0xc7d   : > { %v2370_v14 = vadd.f32 %v2806_v11, %v2362_v12  ;;  %v2363_v15 = vmul.f32 %v2805_v41, %v2355_v13 }
 0xc7f   : > { %2372 = vst [vmem:[#allocation2] sm:$0xff] %v2370_v14  ;;  %2374 = vst [vmem:[%s4170_s7] sm:$0xff] %v2370_v14  ;;  %v2371_v16 = vadd.f32 %v2806_v11, %v2363_v15 }
 0xc81   : > { %2373 = vst [vmem:[#allocation2 + $0x8] sm:$0xff] %v2371_v16  ;;  %2375 = vst [vmem:[%s4170_s7 + $0x8] sm:$0xff] %v2371_v16 }
 0xc82 PF: > { %s4589_s23 = sld [smem:[#allocation22_spill]]  ;;  %s4590_s29 = sld [smem:[#allocation25_spill]] }
 0xc83   : > { %s2831_s20 = sshll.u32 %s3800_s28, 8  ;;  %s4591_s15 = sld [smem:[#allocation44_spill]] }
 0xc84   : > { %s2390_s11 = sshll.u32 %s4170_s7, 4  ;;  %s3678_s28 = smov [#allocation15]   ;;  %s4409_s11 = int_to_ptr.vmem [resolvable:$true] %s2390_s11 }
 0xc85   : > { %s3553_s0 = scalar_lea.vmem %s4409_s11, 256  ;;  %s3557_s19 = sshll.u32 %s3678_s28, 4  ;;  %s3558_s19 = int_to_ptr.vmem [resolvable:$false] %s3557_s19 }
 0xc86   : > { %p3554_p6 = scmp.ne.s32.totalorder %s4409_s11, %s3553_s0  ;;  %s3559_s24 = scalar_lea.vmem %s3558_s19, 512 }
 0xc87   : > { %p3560_p5 = scmp.lt.s32.totalorder %s4409_s11, %s3558_s19  ;;  %p3561_p1 = scmp.lt.s32.totalorder %s3559_s24, %s3553_s0 }
 0xc88   : > { %s4592_s22 = sand.u32 1, %s4589_s23   ;;  %p4593_p4 = scmp.ne.s32.totalorder %s4590_s29, 0 }
 0xc89   : > { %s4406_s1 = scalar_lea.hbm %s4591_s15, %s2831_s20  ;;  %s4413_s8 = scalar_lea.sflag [#allocation5], %s4592_s22 }
 0xc8a   : > { %p3555_p3 = pnand %p3554_p6, %p4593_p4  ;;  %p3562_p10 = por %p3561_p1, %p3560_p5 }
 0xc8c   : > { %p3556_p0 = pneg %p3555_p3 }
 0xc8e   : > { %p3563_p11 = pnand %p3562_p10, %p3556_p0 }
 0xc90   : > { %3566 = shalt.err (!%p3563_p11)
}
 0xc91   : > { %s3567_s7 = scalar_lea.hbm %s4406_s1, 256  ;;  %s3571_s13 = scalar_lea.hbm %s4591_s15, 768 }
 0xc92   : > { %p3568_p7 = scmp.ne.s32.totalorder %s4406_s1, %s3567_s7  ;;  %p3572_p13 = scmp.lt.u32.totalorder %s4406_s1, %s4591_s15 }
 0xc93   : > { %p3573_p12 = scmp.lt.u32.totalorder %s3571_s13, %s3567_s7  ;;  %p3575_p6 = scmp.lt.u32.totalorder %s3567_s7, %s4406_s1 }
 0xc94   : > { %p3569_p2 = pnand %p3568_p7, %p4593_p4 }
 0xc95   : > { %p3574_p9 = por %p3573_p12, %p3572_p13 }
 0xc96   : > { %p3570_p8 = pneg %p3569_p2 }
 0xc97   : > { %p3576_p3 = por %p3575_p6, %p3574_p9 }
 0xc99   : > { %p3577_p0 = pnand %p3576_p3, %p3570_p8 }
 0xc9b   : > { %3580 = shalt.err (!%p3577_p0)
}
 0xc9c   : > { %s3679_s17 = smov 128   ;;  %s3680_s21 = smov 8  }
 0xc9d   : > { %3040 = dma.vmem_to_hbm [thread:$0]  (%p4593_p4), %s4409_s11, 256, %s4406_s1, %s4413_s8, %s3679_s17, %s3679_s17, %s3680_s21  }
 0xc9e PF: > { %s4594_s3 = sld [smem:[#allocation21_spill]]  ;;  %s4595_s5 = sld [smem:[#allocation26_spill]] }
 0xc9f   : > { %p3081_p5 = scmp.ge.s32.totalorder %s3655_s27, 2 }
 0xca4   : > { %s2405_s6 = sand.u32 1, %s4594_s3   ;;  %p4596_p1 = scmp.ne.s32.totalorder %s4595_s5, 0 }
 0xca5   : > { %s2406_s26 = scalar_lea.sflag [#allocation5], %s2405_s6 }
 0xca6   : > { %p3069_p10 = pnand %p3081_p5, %p4596_p1 }
 0xca8   : > { %3626 = dma.done.wait (!%p3069_p10), %s2406_s26, 256  }
 0xca9   : > { %3628 = vsyncadd (!%p3069_p10), %s2406_s26, 4294967040  ;;  %s4597_s27 = sld [smem:[#allocation27_spill]]  ;;  %s4598_s21 = sld [smem:[#allocation22_spill]] }
 0xcaa   : > { %s4599_s22 = sld [smem:[#allocation23_spill]]  ;;  %s4600_s23 = sld [smem:[#allocation28_spill]] }
 0xcab   : > { %s4601_s16 = sld [smem:[#allocation24_spill]]  ;;  %s4602_s26 = sld [smem:[#allocation29_spill]] }
 0xcac   : > { %s4603_s24 = smov %s3647_s25 }
 0xcaf   : > { %p29_p4 = scmp.ge.s32.totalorder %s4597_s27, 5  }
 0xcb1   : > { %s4604_s25 = smov %s4601_s16  ;;  %31 = sbr.rel (!%p29_p4) target bundleno = 24 (0x18), region = 209 }
 0xcb8   :  { %2411 = vsyncpa [#allocation4], 1 }
 0xcb9   :  { %2413 = vsyncpa [#allocation4 + $0x1], 1 }
 0xcba   :  { %2414 = vsyncpa [#allocation7], 1 }
 0xcbb   :  { %2415 = vsyncpa [#allocation10], 1 }
 0xcbc   :  { %2416 = vsyncpa [#allocation5], 1 }
 0xcbd   :  { %2418 = vsyncpa [#allocation5 + $0x1], 1 }

</bundles_post_ra>
